<compile_context>
chip_gen: v7x
topology: tpu7x:2x2x1
jax: 0.10.0
libtpu: 0.0.40
codegen_flags: <defaults>
</compile_context>

<pallas_src>
import functools

import jax
import jax.numpy as jnp
from jax.experimental import pallas as pl
from jax.experimental.pallas import tpu as pltpu


def _asl_kernel(constraint, inv_d, n_actual, row_tile, nj_chunk, need_valid_mask,
                xi_ref, xjT_ref, labi_ref, labj_ref, out_ref):
    xi = xi_ref[0]                         # (TI, D) rows of distribution k, this i-tile
    lab_i = labi_ref[...]                  # (TI, 1) int32
    ti, d_dim = xi.shape
    n_pad = xjT_ref.shape[2]

    # ---- norm penalty for this row tile (padded rows masked out) -----------
    sq = jnp.sum(xi * xi, axis=-1, keepdims=True)          # (TI, 1)
    pen_rows = (jnp.sqrt(sq) - constraint) ** 2            # (TI, 1)
    if need_valid_mask:
        it = pl.program_id(1)
        gi = it * row_tile + jax.lax.broadcasted_iota(jnp.int32, (ti, 1), 0)
        valid_i = gi < n_actual
        pen_sum = jnp.sum(jnp.where(valid_i, pen_rows, 0.0))
    else:
        valid_i = None
        pen_sum = jnp.sum(pen_rows)

    inner_sum = jnp.zeros((), jnp.float32)
    total_sum = jnp.zeros((), jnp.float32)

    # ---- pairwise SmoothL1: j on lanes in chunks, D as innermost reduction --
    # No (N, N, D) intermediate is ever materialized; per-chunk accumulator is
    # (TI, NJ) so it stays (near) register-resident.
    num_chunks = n_pad // nj_chunk
    for jc in range(num_chunks):
        j0 = jc * nj_chunk
        s_acc = jnp.zeros((ti, nj_chunk), jnp.float32)
        for d in range(d_dim):
            col = xi[:, d:d + 1]                             # (TI, 1) -> lane broadcast
            row = xjT_ref[0, d:d + 1, j0:j0 + nj_chunk]      # (1, NJ) -> sublane broadcast
            diff = col - row
            ad = jnp.abs(diff)
            m = jnp.minimum(ad, 1.0)                         # branch-free SmoothL1
            s_acc = s_acc + m * (ad - 0.5 * m)

        lab_j = labj_ref[:, j0:j0 + nj_chunk]                # (1, NJ) int32
        same = lab_i == lab_j                                # (TI, NJ) same-label mask
        if need_valid_mask:
            gj = j0 + jax.lax.broadcasted_iota(jnp.int32, (1, nj_chunk), 1)
            pair_valid = valid_i & (gj < n_actual)
            total_sum = total_sum + jnp.sum(jnp.where(pair_valid, s_acc, 0.0))
            inner_sum = inner_sum + jnp.sum(jnp.where(pair_valid & same, s_acc, 0.0))
        else:
            total_sum = total_sum + jnp.sum(s_acc)
            inner_sum = inner_sum + jnp.sum(jnp.where(same, s_acc, 0.0))

    # ---- single lane-dense (8,128) output block per (k, i_tile) -------------
    # rows 0/1/2 hold the inner / total / penalty partial sums (1/D folded in).
    row_idx = jax.lax.broadcasted_iota(jnp.int32, (8, 128), 0)
    blk = jnp.where(row_idx == 0, inner_sum * inv_d,
          jnp.where(row_idx == 1, total_sum * inv_d,
          jnp.where(row_idx == 2, pen_sum, 0.0)))
    out_ref[0] = blk


def _choose_row_tile(n):
    """Returns (row_tile, n_pad) with row_tile | n_pad and row_tile % 8 == 0."""
    for t in (512, 256, 128, 64, 32, 16, 8):
        if n >= t and n % t == 0:
            return t, n
    n_pad = ((n + 7) // 8) * 8
    for t in (512, 256, 128, 64, 32, 16, 8):
        if n_pad % t == 0:
            return t, n_pad
    return n_pad, n_pad


def _choose_j_chunk(n_pad):
    for c in (512, 256, 128):
        if n_pad >= c and n_pad % c == 0:
            return c
    return n_pad


def aggregation_separation_loss_multi(distributions, labels, lambda_distribution,
                                      constraint=10.0):
    """distributions: (K, N, D); labels: (N,) int; lambda_distribution: (K,)."""
    x = jnp.asarray(distributions, jnp.float32)
    K, N, D = x.shape
    lab = jnp.asarray(labels, jnp.int32)
    lam = jnp.asarray(lambda_distribution, jnp.float32)

    row_tile, n_pad = _choose_row_tile(N)
    nj_chunk = _choose_j_chunk(n_pad)
    num_i = n_pad // row_tile
    need_valid_mask = (n_pad != N)

    if need_valid_mask:
        x_p = jnp.pad(x, ((0, 0), (0, n_pad - N), (0, 0)))
        lab_p = jnp.pad(lab, (0, n_pad - N))
    else:
        x_p, lab_p = x, lab

    xT = jnp.transpose(x_p, (0, 2, 1))                 # (K, D, n_pad): j on lanes
    lab_col = lab_p.reshape(n_pad, 1)                  # i-labels, sublane axis
    lab_row = lab_p.reshape(1, n_pad)                  # j-labels, lane axis

    kernel = functools.partial(
        _asl_kernel, float(constraint), 1.0 / float(D), N, row_tile, nj_chunk,
        need_valid_mask)

    # VMEM budget from actual double-buffered block sizes (+ headroom for the
    # in-kernel (TI, NJ) accumulator and misc scratch).
    vmem_bytes = (2 * row_tile * D * 4          # xi blocks
                  + 2 * D * n_pad * 4           # xjT blocks
                  + 2 * (row_tile + n_pad) * 4  # label blocks
                  + 2 * 8 * 128 * 4             # output blocks
                  + row_tile * nj_chunk * 4     # pair accumulator
                  + (8 << 20))
    vmem_limit = int(min(max(vmem_bytes, 16 << 20), 100 << 20))

    grid_spec = pltpu.PrefetchScalarGridSpec(
        num_scalar_prefetch=0,
        grid=(K, num_i),                      # k outer/slow: xjT is DMA'd once per k
        in_specs=[
            pl.BlockSpec((1, row_tile, D), lambda k, it: (k, it, 0)),
            pl.BlockSpec((1, D, n_pad), lambda k, it: (k, 0, 0)),
            pl.BlockSpec((row_tile, 1), lambda k, it: (it, 0)),
            pl.BlockSpec((1, n_pad), lambda k, it: (0, 0)),
        ],
        out_specs=pl.BlockSpec((1, 8, 128), lambda k, it: (k, it, 0)),
    )

    out = pl.pallas_call(
        kernel,
        out_shape=jax.ShapeDtypeStruct((K, num_i * 8, 128), jnp.float32),
        grid_spec=grid_spec,
        compiler_params=pltpu.CompilerParams(
            dimension_semantics=("parallel", "parallel"),
            vmem_limit_bytes=vmem_limit),
    )(x_p, xT, lab_col, lab_row)

    # Per-(k, i_tile) partials live in rows 0/1/2 of each (8, 128) block.
    inner_k = jnp.sum(out[:, 0::8, 0], axis=1)         # (K,)
    total_k = jnp.sum(out[:, 1::8, 0], axis=1)
    pen_k = jnp.sum(out[:, 2::8, 0], axis=1)
    outer_k = total_k - inner_k

    same = (lab[:, None] == lab[None, :]).astype(jnp.float32)
    n1 = jnp.sum(same)                                  # includes diagonal (matches ref)
    n2 = jnp.float32(N * N) - n1

    inner_k = jnp.where(n1 > 0, inner_k / jnp.maximum(n1, 1.0), 0.0)
    outer_k = jnp.where(n2 > 0, outer_k / jnp.maximum(n2, 1.0), 0.0)
    pen_k = pen_k / jnp.float32(N)

    return (jnp.sum(lam * inner_k), jnp.sum(lam * outer_k), jnp.sum(lam * pen_k))


def _reference(distributions, labels, lambda_distribution, constraint=10.0):
    """Vectorized pure-JAX reference mirroring the PyTorch module."""
    x = jnp.asarray(distributions, jnp.float32)
    K, N, D = x.shape
    lab = jnp.asarray(labels)
    lam = jnp.asarray(lambda_distribution, jnp.float32)
    same = (lab[:, None] == lab[None, :]).astype(jnp.float32)
    diff = x[:, :, None, :] - x[:, None, :, :]                     # (K, N, N, D)
    ad = jnp.abs(diff)
    sl1 = jnp.mean(jnp.where(ad < 1.0, 0.5 * diff * diff, ad - 0.5), axis=-1)
    n1 = jnp.sum(same)
    n2 = jnp.float32(N * N) - n1
    inner_k = jnp.sum(sl1 * same[None], axis=(1, 2))
    outer_k = jnp.sum(sl1 * (1.0 - same)[None], axis=(1, 2))
    inner_k = jnp.where(n1 > 0, inner_k / jnp.maximum(n1, 1.0), 0.0)
    outer_k = jnp.where(n2 > 0, outer_k / jnp.maximum(n2, 1.0), 0.0)
    pen_k = jnp.mean((jnp.linalg.norm(x, axis=2) - constraint) ** 2, axis=1)
    return (jnp.sum(lam * inner_k), jnp.sum(lam * outer_k), jnp.sum(lam * pen_k))


if __name__ == "__main__":
    key = jax.random.PRNGKey(0)
    k1, k2, k3 = jax.random.split(key, 3)

    K, N, D = 3, 16, 32
    distributions = jax.random.normal(k1, (K, N, D), dtype=jnp.float32) * 3.0
    labels = jax.random.randint(k2, (N,), 0, 3, dtype=jnp.int32)
    lambda_distribution = jax.random.uniform(k3, (K,), dtype=jnp.float32)

    inner, outer, pen = aggregation_separation_loss_multi(
        distributions, labels, lambda_distribution, constraint=10.0)
    jax.block_until_ready((inner, outer, pen))

    r_inner, r_outer, r_pen = _reference(
        distributions, labels, lambda_distribution, constraint=10.0)
    assert jnp.allclose(inner, r_inner, rtol=1e-4, atol=1e-4)
    assert jnp.allclose(outer, r_outer, rtol=1e-4, atol=1e-4)
    assert jnp.allclose(pen, r_pen, rtol=1e-4, atol=1e-4)

    print("KERNEL_OK")
</pallas_src>

<mosaic_0001>
module attributes {stable_mosaic.version = 11 : i64} {
  func.func @_asl_kernel(%arg0: i32, %arg1: i32, %arg2: memref<1x16x32xf32, #tpu.memory_space<vmem>>, %arg3: memref<1x32x16xf32, #tpu.memory_space<vmem>>, %arg4: memref<16x1xi32, #tpu.memory_space<vmem>>, %arg5: memref<1x16xi32, #tpu.memory_space<vmem>>, %arg6: memref<1x8x128xf32, #tpu.memory_space<vmem>>) attributes {dimension_semantics = [#tpu.dimension_semantics<parallel>, #tpu.dimension_semantics<parallel>], iteration_bounds = array<i64: 3, 1>, scalar_prefetch = 0 : i64, scratch_operands = 0 : i64, tpu.core_type = #tpu.core_type<tc>, window_params = [{transform_indices = @transform_0, window_bounds = array<i64: 1, 16, 32>}, {transform_indices = @transform_1, window_bounds = array<i64: 1, 32, 16>}, {transform_indices = @transform_2, window_bounds = array<i64: 16, 1>}, {pipeline_mode = #tpu.pipeline_mode<synchronous>, transform_indices = @transform_3, window_bounds = array<i64: 1, 16>}, {transform_indices = @transform_4, window_bounds = array<i64: 1, 8, 128>}]} {
    %c0 = arith.constant 0 : index
    %c0_0 = arith.constant 0 : index
    %c0_1 = arith.constant 0 : index
    %0 = vector.load %arg2[%c0, %c0_0, %c0_1] : memref<1x16x32xf32, #tpu.memory_space<vmem>>, vector<1x16x32xf32>
    %1 = vector.shape_cast %0 : vector<1x16x32xf32> to vector<16x32xf32>
    %c0_2 = arith.constant 0 : index
    %c0_3 = arith.constant 0 : index
    %2 = vector.load %arg4[%c0_2, %c0_3] : memref<16x1xi32, #tpu.memory_space<vmem>>, vector<16x1xi32>
    %3 = arith.mulf %1, %1 : vector<16x32xf32>
    %cst = arith.constant dense<0.000000e+00> : vector<16xf32>
    %4 = vector.multi_reduction <add>, %3, %cst [1] : vector<16x32xf32> to vector<16xf32>
    %5 = vector.shape_cast %4 : vector<16xf32> to vector<16x1xf32>
    %6 = math.sqrt %5 : vector<16x1xf32>
    %cst_4 = arith.constant 1.000000e+01 : f32
    %7 = vector.broadcast %cst_4 : f32 to vector<16x1xf32>
    %8 = arith.subf %6, %7 : vector<16x1xf32>
    %9 = arith.mulf %8, %8 : vector<16x1xf32>
    %10 = vector.shape_cast %9 : vector<16x1xf32> to vector<1x16x1xf32>
    %cst_5 = arith.constant dense<0.000000e+00> : vector<1xf32>
    %11 = vector.multi_reduction <add>, %10, %cst_5 [1, 2] : vector<1x16x1xf32> to vector<1xf32>
    %12 = vector.shape_cast %11 : vector<1xf32> to vector<1x1x1xf32>
    %13 = vector.extract %12[0, 0, 0] : f32 from vector<1x1x1xf32>
    %cst_6 = arith.constant 0.000000e+00 : f32
    %14 = vector.broadcast %cst_6 : f32 to vector<16x16xf32>
    %15 = vector.extract_strided_slice %1 {offsets = [0, 0], sizes = [16, 1], strides = [1, 1]} : vector<16x32xf32> to vector<16x1xf32>
    %c0_7 = arith.constant 0 : index
    %c0_8 = arith.constant 0 : index
    %c0_9 = arith.constant 0 : index
    %16 = vector.load %arg3[%c0_7, %c0_8, %c0_9] : memref<1x32x16xf32, #tpu.memory_space<vmem>>, vector<1x1x16xf32>
    %17 = vector.shape_cast %16 : vector<1x1x16xf32> to vector<1x16xf32>
    %18 = vector.broadcast %15 : vector<16x1xf32> to vector<16x16xf32>
    %19 = vector.broadcast %17 : vector<1x16xf32> to vector<16x16xf32>
    %20 = arith.subf %18, %19 : vector<16x16xf32>
    %21 = math.absf %20 : vector<16x16xf32>
    %cst_10 = arith.constant 1.000000e+00 : f32
    %22 = vector.broadcast %cst_10 : f32 to vector<16x16xf32>
    %23 = arith.minimumf %21, %22 : vector<16x16xf32>
    %cst_11 = arith.constant 5.000000e-01 : f32
    %24 = vector.broadcast %cst_11 : f32 to vector<16x16xf32>
    %25 = arith.mulf %24, %23 : vector<16x16xf32>
    %26 = arith.subf %21, %25 : vector<16x16xf32>
    %27 = arith.mulf %23, %26 : vector<16x16xf32>
    %28 = arith.addf %14, %27 : vector<16x16xf32>
    %29 = vector.extract_strided_slice %1 {offsets = [0, 1], sizes = [16, 1], strides = [1, 1]} : vector<16x32xf32> to vector<16x1xf32>
    %c0_12 = arith.constant 0 : index
    %c1 = arith.constant 1 : index
    %c0_13 = arith.constant 0 : index
    %30 = vector.load %arg3[%c0_12, %c1, %c0_13] : memref<1x32x16xf32, #tpu.memory_space<vmem>>, vector<1x1x16xf32>
    %31 = vector.shape_cast %30 : vector<1x1x16xf32> to vector<1x16xf32>
    %32 = vector.broadcast %29 : vector<16x1xf32> to vector<16x16xf32>
    %33 = vector.broadcast %31 : vector<1x16xf32> to vector<16x16xf32>
    %34 = arith.subf %32, %33 : vector<16x16xf32>
    %35 = math.absf %34 : vector<16x16xf32>
    %cst_14 = arith.constant 1.000000e+00 : f32
    %36 = vector.broadcast %cst_14 : f32 to vector<16x16xf32>
    %37 = arith.minimumf %35, %36 : vector<16x16xf32>
    %cst_15 = arith.constant 5.000000e-01 : f32
    %38 = vector.broadcast %cst_15 : f32 to vector<16x16xf32>
    %39 = arith.mulf %38, %37 : vector<16x16xf32>
    %40 = arith.subf %35, %39 : vector<16x16xf32>
    %41 = arith.mulf %37, %40 : vector<16x16xf32>
    %42 = arith.addf %28, %41 : vector<16x16xf32>
    %43 = vector.extract_strided_slice %1 {offsets = [0, 2], sizes = [16, 1], strides = [1, 1]} : vector<16x32xf32> to vector<16x1xf32>
    %c0_16 = arith.constant 0 : index
    %c2 = arith.constant 2 : index
    %c0_17 = arith.constant 0 : index
    %44 = vector.load %arg3[%c0_16, %c2, %c0_17] : memref<1x32x16xf32, #tpu.memory_space<vmem>>, vector<1x1x16xf32>
    %45 = vector.shape_cast %44 : vector<1x1x16xf32> to vector<1x16xf32>
    %46 = vector.broadcast %43 : vector<16x1xf32> to vector<16x16xf32>
    %47 = vector.broadcast %45 : vector<1x16xf32> to vector<16x16xf32>
    %48 = arith.subf %46, %47 : vector<16x16xf32>
    %49 = math.absf %48 : vector<16x16xf32>
    %cst_18 = arith.constant 1.000000e+00 : f32
    %50 = vector.broadcast %cst_18 : f32 to vector<16x16xf32>
    %51 = arith.minimumf %49, %50 : vector<16x16xf32>
    %cst_19 = arith.constant 5.000000e-01 : f32
    %52 = vector.broadcast %cst_19 : f32 to vector<16x16xf32>
    %53 = arith.mulf %52, %51 : vector<16x16xf32>
    %54 = arith.subf %49, %53 : vector<16x16xf32>
    %55 = arith.mulf %51, %54 : vector<16x16xf32>
    %56 = arith.addf %42, %55 : vector<16x16xf32>
    %57 = vector.extract_strided_slice %1 {offsets = [0, 3], sizes = [16, 1], strides = [1, 1]} : vector<16x32xf32> to vector<16x1xf32>
    %c0_20 = arith.constant 0 : index
    %c3 = arith.constant 3 : index
    %c0_21 = arith.constant 0 : index
    %58 = vector.load %arg3[%c0_20, %c3, %c0_21] : memref<1x32x16xf32, #tpu.memory_space<vmem>>, vector<1x1x16xf32>
    %59 = vector.shape_cast %58 : vector<1x1x16xf32> to vector<1x16xf32>
    %60 = vector.broadcast %57 : vector<16x1xf32> to vector<16x16xf32>
    %61 = vector.broadcast %59 : vector<1x16xf32> to vector<16x16xf32>
    %62 = arith.subf %60, %61 : vector<16x16xf32>
    %63 = math.absf %62 : vector<16x16xf32>
    %cst_22 = arith.constant 1.000000e+00 : f32
    %64 = vector.broadcast %cst_22 : f32 to vector<16x16xf32>
    %65 = arith.minimumf %63, %64 : vector<16x16xf32>
    %cst_23 = arith.constant 5.000000e-01 : f32
    %66 = vector.broadcast %cst_23 : f32 to vector<16x16xf32>
    %67 = arith.mulf %66, %65 : vector<16x16xf32>
    %68 = arith.subf %63, %67 : vector<16x16xf32>
    %69 = arith.mulf %65, %68 : vector<16x16xf32>
    %70 = arith.addf %56, %69 : vector<16x16xf32>
    %71 = vector.extract_strided_slice %1 {offsets = [0, 4], sizes = [16, 1], strides = [1, 1]} : vector<16x32xf32> to vector<16x1xf32>
    %c0_24 = arith.constant 0 : index
    %c4 = arith.constant 4 : index
    %c0_25 = arith.constant 0 : index
    %72 = vector.load %arg3[%c0_24, %c4, %c0_25] : memref<1x32x16xf32, #tpu.memory_space<vmem>>, vector<1x1x16xf32>
    %73 = vector.shape_cast %72 : vector<1x1x16xf32> to vector<1x16xf32>
    %74 = vector.broadcast %71 : vector<16x1xf32> to vector<16x16xf32>
    %75 = vector.broadcast %73 : vector<1x16xf32> to vector<16x16xf32>
    %76 = arith.subf %74, %75 : vector<16x16xf32>
    %77 = math.absf %76 : vector<16x16xf32>
    %cst_26 = arith.constant 1.000000e+00 : f32
    %78 = vector.broadcast %cst_26 : f32 to vector<16x16xf32>
    %79 = arith.minimumf %77, %78 : vector<16x16xf32>
    %cst_27 = arith.constant 5.000000e-01 : f32
    %80 = vector.broadcast %cst_27 : f32 to vector<16x16xf32>
    %81 = arith.mulf %80, %79 : vector<16x16xf32>
    %82 = arith.subf %77, %81 : vector<16x16xf32>
    %83 = arith.mulf %79, %82 : vector<16x16xf32>
    %84 = arith.addf %70, %83 : vector<16x16xf32>
    %85 = vector.extract_strided_slice %1 {offsets = [0, 5], sizes = [16, 1], strides = [1, 1]} : vector<16x32xf32> to vector<16x1xf32>
    %c0_28 = arith.constant 0 : index
    %c5 = arith.constant 5 : index
    %c0_29 = arith.constant 0 : index
    %86 = vector.load %arg3[%c0_28, %c5, %c0_29] : memref<1x32x16xf32, #tpu.memory_space<vmem>>, vector<1x1x16xf32>
    %87 = vector.shape_cast %86 : vector<1x1x16xf32> to vector<1x16xf32>
    %88 = vector.broadcast %85 : vector<16x1xf32> to vector<16x16xf32>
    %89 = vector.broadcast %87 : vector<1x16xf32> to vector<16x16xf32>
    %90 = arith.subf %88, %89 : vector<16x16xf32>
    %91 = math.absf %90 : vector<16x16xf32>
    %cst_30 = arith.constant 1.000000e+00 : f32
    %92 = vector.broadcast %cst_30 : f32 to vector<16x16xf32>
    %93 = arith.minimumf %91, %92 : vector<16x16xf32>
    %cst_31 = arith.constant 5.000000e-01 : f32
    %94 = vector.broadcast %cst_31 : f32 to vector<16x16xf32>
    %95 = arith.mulf %94, %93 : vector<16x16xf32>
    %96 = arith.subf %91, %95 : vector<16x16xf32>
    %97 = arith.mulf %93, %96 : vector<16x16xf32>
    %98 = arith.addf %84, %97 : vector<16x16xf32>
    %99 = vector.extract_strided_slice %1 {offsets = [0, 6], sizes = [16, 1], strides = [1, 1]} : vector<16x32xf32> to vector<16x1xf32>
    %c0_32 = arith.constant 0 : index
    %c6 = arith.constant 6 : index
    %c0_33 = arith.constant 0 : index
    %100 = vector.load %arg3[%c0_32, %c6, %c0_33] : memref<1x32x16xf32, #tpu.memory_space<vmem>>, vector<1x1x16xf32>
    %101 = vector.shape_cast %100 : vector<1x1x16xf32> to vector<1x16xf32>
    %102 = vector.broadcast %99 : vector<16x1xf32> to vector<16x16xf32>
    %103 = vector.broadcast %101 : vector<1x16xf32> to vector<16x16xf32>
    %104 = arith.subf %102, %103 : vector<16x16xf32>
    %105 = math.absf %104 : vector<16x16xf32>
    %cst_34 = arith.constant 1.000000e+00 : f32
    %106 = vector.broadcast %cst_34 : f32 to vector<16x16xf32>
    %107 = arith.minimumf %105, %106 : vector<16x16xf32>
    %cst_35 = arith.constant 5.000000e-01 : f32
    %108 = vector.broadcast %cst_35 : f32 to vector<16x16xf32>
    %109 = arith.mulf %108, %107 : vector<16x16xf32>
    %110 = arith.subf %105, %109 : vector<16x16xf32>
    %111 = arith.mulf %107, %110 : vector<16x16xf32>
    %112 = arith.addf %98, %111 : vector<16x16xf32>
    %113 = vector.extract_strided_slice %1 {offsets = [0, 7], sizes = [16, 1], strides = [1, 1]} : vector<16x32xf32> to vector<16x1xf32>
    %c0_36 = arith.constant 0 : index
    %c7 = arith.constant 7 : index
    %c0_37 = arith.constant 0 : index
    %114 = vector.load %arg3[%c0_36, %c7, %c0_37] : memref<1x32x16xf32, #tpu.memory_space<vmem>>, vector<1x1x16xf32>
    %115 = vector.shape_cast %114 : vector<1x1x16xf32> to vector<1x16xf32>
    %116 = vector.broadcast %113 : vector<16x1xf32> to vector<16x16xf32>
    %117 = vector.broadcast %115 : vector<1x16xf32> to vector<16x16xf32>
    %118 = arith.subf %116, %117 : vector<16x16xf32>
    %119 = math.absf %118 : vector<16x16xf32>
    %cst_38 = arith.constant 1.000000e+00 : f32
    %120 = vector.broadcast %cst_38 : f32 to vector<16x16xf32>
    %121 = arith.minimumf %119, %120 : vector<16x16xf32>
    %cst_39 = arith.constant 5.000000e-01 : f32
    %122 = vector.broadcast %cst_39 : f32 to vector<16x16xf32>
    %123 = arith.mulf %122, %121 : vector<16x16xf32>
    %124 = arith.subf %119, %123 : vector<16x16xf32>
    %125 = arith.mulf %121, %124 : vector<16x16xf32>
    %126 = arith.addf %112, %125 : vector<16x16xf32>
    %127 = vector.extract_strided_slice %1 {offsets = [0, 8], sizes = [16, 1], strides = [1, 1]} : vector<16x32xf32> to vector<16x1xf32>
    %c0_40 = arith.constant 0 : index
    %c8 = arith.constant 8 : index
    %c0_41 = arith.constant 0 : index
    %128 = vector.load %arg3[%c0_40, %c8, %c0_41] : memref<1x32x16xf32, #tpu.memory_space<vmem>>, vector<1x1x16xf32>
    %129 = vector.shape_cast %128 : vector<1x1x16xf32> to vector<1x16xf32>
    %130 = vector.broadcast %127 : vector<16x1xf32> to vector<16x16xf32>
    %131 = vector.broadcast %129 : vector<1x16xf32> to vector<16x16xf32>
    %132 = arith.subf %130, %131 : vector<16x16xf32>
    %133 = math.absf %132 : vector<16x16xf32>
    %cst_42 = arith.constant 1.000000e+00 : f32
    %134 = vector.broadcast %cst_42 : f32 to vector<16x16xf32>
    %135 = arith.minimumf %133, %134 : vector<16x16xf32>
    %cst_43 = arith.constant 5.000000e-01 : f32
    %136 = vector.broadcast %cst_43 : f32 to vector<16x16xf32>
    %137 = arith.mulf %136, %135 : vector<16x16xf32>
    %138 = arith.subf %133, %137 : vector<16x16xf32>
    %139 = arith.mulf %135, %138 : vector<16x16xf32>
    %140 = arith.addf %126, %139 : vector<16x16xf32>
    %141 = vector.extract_strided_slice %1 {offsets = [0, 9], sizes = [16, 1], strides = [1, 1]} : vector<16x32xf32> to vector<16x1xf32>
    %c0_44 = arith.constant 0 : index
    %c9 = arith.constant 9 : index
    %c0_45 = arith.constant 0 : index
    %142 = vector.load %arg3[%c0_44, %c9, %c0_45] : memref<1x32x16xf32, #tpu.memory_space<vmem>>, vector<1x1x16xf32>
    %143 = vector.shape_cast %142 : vector<1x1x16xf32> to vector<1x16xf32>
    %144 = vector.broadcast %141 : vector<16x1xf32> to vector<16x16xf32>
    %145 = vector.broadcast %143 : vector<1x16xf32> to vector<16x16xf32>
    %146 = arith.subf %144, %145 : vector<16x16xf32>
    %147 = math.absf %146 : vector<16x16xf32>
    %cst_46 = arith.constant 1.000000e+00 : f32
    %148 = vector.broadcast %cst_46 : f32 to vector<16x16xf32>
    %149 = arith.minimumf %147, %148 : vector<16x16xf32>
    %cst_47 = arith.constant 5.000000e-01 : f32
    %150 = vector.broadcast %cst_47 : f32 to vector<16x16xf32>
    %151 = arith.mulf %150, %149 : vector<16x16xf32>
    %152 = arith.subf %147, %151 : vector<16x16xf32>
    %153 = arith.mulf %149, %152 : vector<16x16xf32>
    %154 = arith.addf %140, %153 : vector<16x16xf32>
    %155 = vector.extract_strided_slice %1 {offsets = [0, 10], sizes = [16, 1], strides = [1, 1]} : vector<16x32xf32> to vector<16x1xf32>
    %c0_48 = arith.constant 0 : index
    %c10 = arith.constant 10 : index
    %c0_49 = arith.constant 0 : index
    %156 = vector.load %arg3[%c0_48, %c10, %c0_49] : memref<1x32x16xf32, #tpu.memory_space<vmem>>, vector<1x1x16xf32>
    %157 = vector.shape_cast %156 : vector<1x1x16xf32> to vector<1x16xf32>
    %158 = vector.broadcast %155 : vector<16x1xf32> to vector<16x16xf32>
    %159 = vector.broadcast %157 : vector<1x16xf32> to vector<16x16xf32>
    %160 = arith.subf %158, %159 : vector<16x16xf32>
    %161 = math.absf %160 : vector<16x16xf32>
    %cst_50 = arith.constant 1.000000e+00 : f32
    %162 = vector.broadcast %cst_50 : f32 to vector<16x16xf32>
    %163 = arith.minimumf %161, %162 : vector<16x16xf32>
    %cst_51 = arith.constant 5.000000e-01 : f32
    %164 = vector.broadcast %cst_51 : f32 to vector<16x16xf32>
    %165 = arith.mulf %164, %163 : vector<16x16xf32>
    %166 = arith.subf %161, %165 : vector<16x16xf32>
    %167 = arith.mulf %163, %166 : vector<16x16xf32>
    %168 = arith.addf %154, %167 : vector<16x16xf32>
    %169 = vector.extract_strided_slice %1 {offsets = [0, 11], sizes = [16, 1], strides = [1, 1]} : vector<16x32xf32> to vector<16x1xf32>
    %c0_52 = arith.constant 0 : index
    %c11 = arith.constant 11 : index
    %c0_53 = arith.constant 0 : index
    %170 = vector.load %arg3[%c0_52, %c11, %c0_53] : memref<1x32x16xf32, #tpu.memory_space<vmem>>, vector<1x1x16xf32>
    %171 = vector.shape_cast %170 : vector<1x1x16xf32> to vector<1x16xf32>
    %172 = vector.broadcast %169 : vector<16x1xf32> to vector<16x16xf32>
    %173 = vector.broadcast %171 : vector<1x16xf32> to vector<16x16xf32>
    %174 = arith.subf %172, %173 : vector<16x16xf32>
    %175 = math.absf %174 : vector<16x16xf32>
    %cst_54 = arith.constant 1.000000e+00 : f32
    %176 = vector.broadcast %cst_54 : f32 to vector<16x16xf32>
    %177 = arith.minimumf %175, %176 : vector<16x16xf32>
    %cst_55 = arith.constant 5.000000e-01 : f32
    %178 = vector.broadcast %cst_55 : f32 to vector<16x16xf32>
    %179 = arith.mulf %178, %177 : vector<16x16xf32>
    %180 = arith.subf %175, %179 : vector<16x16xf32>
    %181 = arith.mulf %177, %180 : vector<16x16xf32>
    %182 = arith.addf %168, %181 : vector<16x16xf32>
    %183 = vector.extract_strided_slice %1 {offsets = [0, 12], sizes = [16, 1], strides = [1, 1]} : vector<16x32xf32> to vector<16x1xf32>
    %c0_56 = arith.constant 0 : index
    %c12 = arith.constant 12 : index
    %c0_57 = arith.constant 0 : index
    %184 = vector.load %arg3[%c0_56, %c12, %c0_57] : memref<1x32x16xf32, #tpu.memory_space<vmem>>, vector<1x1x16xf32>
    %185 = vector.shape_cast %184 : vector<1x1x16xf32> to vector<1x16xf32>
    %186 = vector.broadcast %183 : vector<16x1xf32> to vector<16x16xf32>
    %187 = vector.broadcast %185 : vector<1x16xf32> to vector<16x16xf32>
    %188 = arith.subf %186, %187 : vector<16x16xf32>
    %189 = math.absf %188 : vector<16x16xf32>
    %cst_58 = arith.constant 1.000000e+00 : f32
    %190 = vector.broadcast %cst_58 : f32 to vector<16x16xf32>
    %191 = arith.minimumf %189, %190 : vector<16x16xf32>
    %cst_59 = arith.constant 5.000000e-01 : f32
    %192 = vector.broadcast %cst_59 : f32 to vector<16x16xf32>
    %193 = arith.mulf %192, %191 : vector<16x16xf32>
    %194 = arith.subf %189, %193 : vector<16x16xf32>
    %195 = arith.mulf %191, %194 : vector<16x16xf32>
    %196 = arith.addf %182, %195 : vector<16x16xf32>
    %197 = vector.extract_strided_slice %1 {offsets = [0, 13], sizes = [16, 1], strides = [1, 1]} : vector<16x32xf32> to vector<16x1xf32>
    %c0_60 = arith.constant 0 : index
    %c13 = arith.constant 13 : index
    %c0_61 = arith.constant 0 : index
    %198 = vector.load %arg3[%c0_60, %c13, %c0_61] : memref<1x32x16xf32, #tpu.memory_space<vmem>>, vector<1x1x16xf32>
    %199 = vector.shape_cast %198 : vector<1x1x16xf32> to vector<1x16xf32>
    %200 = vector.broadcast %197 : vector<16x1xf32> to vector<16x16xf32>
    %201 = vector.broadcast %199 : vector<1x16xf32> to vector<16x16xf32>
    %202 = arith.subf %200, %201 : vector<16x16xf32>
    %203 = math.absf %202 : vector<16x16xf32>
    %cst_62 = arith.constant 1.000000e+00 : f32
    %204 = vector.broadcast %cst_62 : f32 to vector<16x16xf32>
    %205 = arith.minimumf %203, %204 : vector<16x16xf32>
    %cst_63 = arith.constant 5.000000e-01 : f32
    %206 = vector.broadcast %cst_63 : f32 to vector<16x16xf32>
    %207 = arith.mulf %206, %205 : vector<16x16xf32>
    %208 = arith.subf %203, %207 : vector<16x16xf32>
    %209 = arith.mulf %205, %208 : vector<16x16xf32>
    %210 = arith.addf %196, %209 : vector<16x16xf32>
    %211 = vector.extract_strided_slice %1 {offsets = [0, 14], sizes = [16, 1], strides = [1, 1]} : vector<16x32xf32> to vector<16x1xf32>
    %c0_64 = arith.constant 0 : index
    %c14 = arith.constant 14 : index
    %c0_65 = arith.constant 0 : index
    %212 = vector.load %arg3[%c0_64, %c14, %c0_65] : memref<1x32x16xf32, #tpu.memory_space<vmem>>, vector<1x1x16xf32>
    %213 = vector.shape_cast %212 : vector<1x1x16xf32> to vector<1x16xf32>
    %214 = vector.broadcast %211 : vector<16x1xf32> to vector<16x16xf32>
    %215 = vector.broadcast %213 : vector<1x16xf32> to vector<16x16xf32>
    %216 = arith.subf %214, %215 : vector<16x16xf32>
    %217 = math.absf %216 : vector<16x16xf32>
    %cst_66 = arith.constant 1.000000e+00 : f32
    %218 = vector.broadcast %cst_66 : f32 to vector<16x16xf32>
    %219 = arith.minimumf %217, %218 : vector<16x16xf32>
    %cst_67 = arith.constant 5.000000e-01 : f32
    %220 = vector.broadcast %cst_67 : f32 to vector<16x16xf32>
    %221 = arith.mulf %220, %219 : vector<16x16xf32>
    %222 = arith.subf %217, %221 : vector<16x16xf32>
    %223 = arith.mulf %219, %222 : vector<16x16xf32>
    %224 = arith.addf %210, %223 : vector<16x16xf32>
    %225 = vector.extract_strided_slice %1 {offsets = [0, 15], sizes = [16, 1], strides = [1, 1]} : vector<16x32xf32> to vector<16x1xf32>
    %c0_68 = arith.constant 0 : index
    %c15 = arith.constant 15 : index
    %c0_69 = arith.constant 0 : index
    %226 = vector.load %arg3[%c0_68, %c15, %c0_69] : memref<1x32x16xf32, #tpu.memory_space<vmem>>, vector<1x1x16xf32>
    %227 = vector.shape_cast %226 : vector<1x1x16xf32> to vector<1x16xf32>
    %228 = vector.broadcast %225 : vector<16x1xf32> to vector<16x16xf32>
    %229 = vector.broadcast %227 : vector<1x16xf32> to vector<16x16xf32>
    %230 = arith.subf %228, %229 : vector<16x16xf32>
    %231 = math.absf %230 : vector<16x16xf32>
    %cst_70 = arith.constant 1.000000e+00 : f32
    %232 = vector.broadcast %cst_70 : f32 to vector<16x16xf32>
    %233 = arith.minimumf %231, %232 : vector<16x16xf32>
    %cst_71 = arith.constant 5.000000e-01 : f32
    %234 = vector.broadcast %cst_71 : f32 to vector<16x16xf32>
    %235 = arith.mulf %234, %233 : vector<16x16xf32>
    %236 = arith.subf %231, %235 : vector<16x16xf32>
    %237 = arith.mulf %233, %236 : vector<16x16xf32>
    %238 = arith.addf %224, %237 : vector<16x16xf32>
    %239 = vector.extract_strided_slice %1 {offsets = [0, 16], sizes = [16, 1], strides = [1, 1]} : vector<16x32xf32> to vector<16x1xf32>
    %c0_72 = arith.constant 0 : index
    %c16 = arith.constant 16 : index
    %c0_73 = arith.constant 0 : index
    %240 = vector.load %arg3[%c0_72, %c16, %c0_73] : memref<1x32x16xf32, #tpu.memory_space<vmem>>, vector<1x1x16xf32>
    %241 = vector.shape_cast %240 : vector<1x1x16xf32> to vector<1x16xf32>
    %242 = vector.broadcast %239 : vector<16x1xf32> to vector<16x16xf32>
    %243 = vector.broadcast %241 : vector<1x16xf32> to vector<16x16xf32>
    %244 = arith.subf %242, %243 : vector<16x16xf32>
    %245 = math.absf %244 : vector<16x16xf32>
    %cst_74 = arith.constant 1.000000e+00 : f32
    %246 = vector.broadcast %cst_74 : f32 to vector<16x16xf32>
    %247 = arith.minimumf %245, %246 : vector<16x16xf32>
    %cst_75 = arith.constant 5.000000e-01 : f32
    %248 = vector.broadcast %cst_75 : f32 to vector<16x16xf32>
    %249 = arith.mulf %248, %247 : vector<16x16xf32>
    %250 = arith.subf %245, %249 : vector<16x16xf32>
    %251 = arith.mulf %247, %250 : vector<16x16xf32>
    %252 = arith.addf %238, %251 : vector<16x16xf32>
    %253 = vector.extract_strided_slice %1 {offsets = [0, 17], sizes = [16, 1], strides = [1, 1]} : vector<16x32xf32> to vector<16x1xf32>
    %c0_76 = arith.constant 0 : index
    %c17 = arith.constant 17 : index
    %c0_77 = arith.constant 0 : index
    %254 = vector.load %arg3[%c0_76, %c17, %c0_77] : memref<1x32x16xf32, #tpu.memory_space<vmem>>, vector<1x1x16xf32>
    %255 = vector.shape_cast %254 : vector<1x1x16xf32> to vector<1x16xf32>
    %256 = vector.broadcast %253 : vector<16x1xf32> to vector<16x16xf32>
    %257 = vector.broadcast %255 : vector<1x16xf32> to vector<16x16xf32>
    %258 = arith.subf %256, %257 : vector<16x16xf32>
    %259 = math.absf %258 : vector<16x16xf32>
    %cst_78 = arith.constant 1.000000e+00 : f32
    %260 = vector.broadcast %cst_78 : f32 to vector<16x16xf32>
    %261 = arith.minimumf %259, %260 : vector<16x16xf32>
    %cst_79 = arith.constant 5.000000e-01 : f32
    %262 = vector.broadcast %cst_79 : f32 to vector<16x16xf32>
    %263 = arith.mulf %262, %261 : vector<16x16xf32>
    %264 = arith.subf %259, %263 : vector<16x16xf32>
    %265 = arith.mulf %261, %264 : vector<16x16xf32>
    %266 = arith.addf %252, %265 : vector<16x16xf32>
    %267 = vector.extract_strided_slice %1 {offsets = [0, 18], sizes = [16, 1], strides = [1, 1]} : vector<16x32xf32> to vector<16x1xf32>
    %c0_80 = arith.constant 0 : index
    %c18 = arith.constant 18 : index
    %c0_81 = arith.constant 0 : index
    %268 = vector.load %arg3[%c0_80, %c18, %c0_81] : memref<1x32x16xf32, #tpu.memory_space<vmem>>, vector<1x1x16xf32>
    %269 = vector.shape_cast %268 : vector<1x1x16xf32> to vector<1x16xf32>
    %270 = vector.broadcast %267 : vector<16x1xf32> to vector<16x16xf32>
    %271 = vector.broadcast %269 : vector<1x16xf32> to vector<16x16xf32>
    %272 = arith.subf %270, %271 : vector<16x16xf32>
    %273 = math.absf %272 : vector<16x16xf32>
    %cst_82 = arith.constant 1.000000e+00 : f32
    %274 = vector.broadcast %cst_82 : f32 to vector<16x16xf32>
    %275 = arith.minimumf %273, %274 : vector<16x16xf32>
    %cst_83 = arith.constant 5.000000e-01 : f32
    %276 = vector.broadcast %cst_83 : f32 to vector<16x16xf32>
    %277 = arith.mulf %276, %275 : vector<16x16xf32>
    %278 = arith.subf %273, %277 : vector<16x16xf32>
    %279 = arith.mulf %275, %278 : vector<16x16xf32>
    %280 = arith.addf %266, %279 : vector<16x16xf32>
    %281 = vector.extract_strided_slice %1 {offsets = [0, 19], sizes = [16, 1], strides = [1, 1]} : vector<16x32xf32> to vector<16x1xf32>
    %c0_84 = arith.constant 0 : index
    %c19 = arith.constant 19 : index
    %c0_85 = arith.constant 0 : index
    %282 = vector.load %arg3[%c0_84, %c19, %c0_85] : memref<1x32x16xf32, #tpu.memory_space<vmem>>, vector<1x1x16xf32>
    %283 = vector.shape_cast %282 : vector<1x1x16xf32> to vector<1x16xf32>
    %284 = vector.broadcast %281 : vector<16x1xf32> to vector<16x16xf32>
    %285 = vector.broadcast %283 : vector<1x16xf32> to vector<16x16xf32>
    %286 = arith.subf %284, %285 : vector<16x16xf32>
    %287 = math.absf %286 : vector<16x16xf32>
    %cst_86 = arith.constant 1.000000e+00 : f32
    %288 = vector.broadcast %cst_86 : f32 to vector<16x16xf32>
    %289 = arith.minimumf %287, %288 : vector<16x16xf32>
    %cst_87 = arith.constant 5.000000e-01 : f32
    %290 = vector.broadcast %cst_87 : f32 to vector<16x16xf32>
    %291 = arith.mulf %290, %289 : vector<16x16xf32>
    %292 = arith.subf %287, %291 : vector<16x16xf32>
    %293 = arith.mulf %289, %292 : vector<16x16xf32>
    %294 = arith.addf %280, %293 : vector<16x16xf32>
    %295 = vector.extract_strided_slice %1 {offsets = [0, 20], sizes = [16, 1], strides = [1, 1]} : vector<16x32xf32> to vector<16x1xf32>
    %c0_88 = arith.constant 0 : index
    %c20 = arith.constant 20 : index
    %c0_89 = arith.constant 0 : index
    %296 = vector.load %arg3[%c0_88, %c20, %c0_89] : memref<1x32x16xf32, #tpu.memory_space<vmem>>, vector<1x1x16xf32>
    %297 = vector.shape_cast %296 : vector<1x1x16xf32> to vector<1x16xf32>
    %298 = vector.broadcast %295 : vector<16x1xf32> to vector<16x16xf32>
    %299 = vector.broadcast %297 : vector<1x16xf32> to vector<16x16xf32>
    %300 = arith.subf %298, %299 : vector<16x16xf32>
    %301 = math.absf %300 : vector<16x16xf32>
    %cst_90 = arith.constant 1.000000e+00 : f32
    %302 = vector.broadcast %cst_90 : f32 to vector<16x16xf32>
    %303 = arith.minimumf %301, %302 : vector<16x16xf32>
    %cst_91 = arith.constant 5.000000e-01 : f32
    %304 = vector.broadcast %cst_91 : f32 to vector<16x16xf32>
    %305 = arith.mulf %304, %303 : vector<16x16xf32>
    %306 = arith.subf %301, %305 : vector<16x16xf32>
    %307 = arith.mulf %303, %306 : vector<16x16xf32>
    %308 = arith.addf %294, %307 : vector<16x16xf32>
    %309 = vector.extract_strided_slice %1 {offsets = [0, 21], sizes = [16, 1], strides = [1, 1]} : vector<16x32xf32> to vector<16x1xf32>
    %c0_92 = arith.constant 0 : index
    %c21 = arith.constant 21 : index
    %c0_93 = arith.constant 0 : index
    %310 = vector.load %arg3[%c0_92, %c21, %c0_93] : memref<1x32x16xf32, #tpu.memory_space<vmem>>, vector<1x1x16xf32>
    %311 = vector.shape_cast %310 : vector<1x1x16xf32> to vector<1x16xf32>
    %312 = vector.broadcast %309 : vector<16x1xf32> to vector<16x16xf32>
    %313 = vector.broadcast %311 : vector<1x16xf32> to vector<16x16xf32>
    %314 = arith.subf %312, %313 : vector<16x16xf32>
    %315 = math.absf %314 : vector<16x16xf32>
    %cst_94 = arith.constant 1.000000e+00 : f32
    %316 = vector.broadcast %cst_94 : f32 to vector<16x16xf32>
    %317 = arith.minimumf %315, %316 : vector<16x16xf32>
    %cst_95 = arith.constant 5.000000e-01 : f32
    %318 = vector.broadcast %cst_95 : f32 to vector<16x16xf32>
    %319 = arith.mulf %318, %317 : vector<16x16xf32>
    %320 = arith.subf %315, %319 : vector<16x16xf32>
    %321 = arith.mulf %317, %320 : vector<16x16xf32>
    %322 = arith.addf %308, %321 : vector<16x16xf32>
    %323 = vector.extract_strided_slice %1 {offsets = [0, 22], sizes = [16, 1], strides = [1, 1]} : vector<16x32xf32> to vector<16x1xf32>
    %c0_96 = arith.constant 0 : index
    %c22 = arith.constant 22 : index
    %c0_97 = arith.constant 0 : index
    %324 = vector.load %arg3[%c0_96, %c22, %c0_97] : memref<1x32x16xf32, #tpu.memory_space<vmem>>, vector<1x1x16xf32>
    %325 = vector.shape_cast %324 : vector<1x1x16xf32> to vector<1x16xf32>
    %326 = vector.broadcast %323 : vector<16x1xf32> to vector<16x16xf32>
    %327 = vector.broadcast %325 : vector<1x16xf32> to vector<16x16xf32>
    %328 = arith.subf %326, %327 : vector<16x16xf32>
    %329 = math.absf %328 : vector<16x16xf32>
    %cst_98 = arith.constant 1.000000e+00 : f32
    %330 = vector.broadcast %cst_98 : f32 to vector<16x16xf32>
    %331 = arith.minimumf %329, %330 : vector<16x16xf32>
    %cst_99 = arith.constant 5.000000e-01 : f32
    %332 = vector.broadcast %cst_99 : f32 to vector<16x16xf32>
    %333 = arith.mulf %332, %331 : vector<16x16xf32>
    %334 = arith.subf %329, %333 : vector<16x16xf32>
    %335 = arith.mulf %331, %334 : vector<16x16xf32>
    %336 = arith.addf %322, %335 : vector<16x16xf32>
    %337 = vector.extract_strided_slice %1 {offsets = [0, 23], sizes = [16, 1], strides = [1, 1]} : vector<16x32xf32> to vector<16x1xf32>
    %c0_100 = arith.constant 0 : index
    %c23 = arith.constant 23 : index
    %c0_101 = arith.constant 0 : index
    %338 = vector.load %arg3[%c0_100, %c23, %c0_101] : memref<1x32x16xf32, #tpu.memory_space<vmem>>, vector<1x1x16xf32>
    %339 = vector.shape_cast %338 : vector<1x1x16xf32> to vector<1x16xf32>
    %340 = vector.broadcast %337 : vector<16x1xf32> to vector<16x16xf32>
    %341 = vector.broadcast %339 : vector<1x16xf32> to vector<16x16xf32>
    %342 = arith.subf %340, %341 : vector<16x16xf32>
    %343 = math.absf %342 : vector<16x16xf32>
    %cst_102 = arith.constant 1.000000e+00 : f32
    %344 = vector.broadcast %cst_102 : f32 to vector<16x16xf32>
    %345 = arith.minimumf %343, %344 : vector<16x16xf32>
    %cst_103 = arith.constant 5.000000e-01 : f32
    %346 = vector.broadcast %cst_103 : f32 to vector<16x16xf32>
    %347 = arith.mulf %346, %345 : vector<16x16xf32>
    %348 = arith.subf %343, %347 : vector<16x16xf32>
    %349 = arith.mulf %345, %348 : vector<16x16xf32>
    %350 = arith.addf %336, %349 : vector<16x16xf32>
    %351 = vector.extract_strided_slice %1 {offsets = [0, 24], sizes = [16, 1], strides = [1, 1]} : vector<16x32xf32> to vector<16x1xf32>
    %c0_104 = arith.constant 0 : index
    %c24 = arith.constant 24 : index
    %c0_105 = arith.constant 0 : index
    %352 = vector.load %arg3[%c0_104, %c24, %c0_105] : memref<1x32x16xf32, #tpu.memory_space<vmem>>, vector<1x1x16xf32>
    %353 = vector.shape_cast %352 : vector<1x1x16xf32> to vector<1x16xf32>
    %354 = vector.broadcast %351 : vector<16x1xf32> to vector<16x16xf32>
    %355 = vector.broadcast %353 : vector<1x16xf32> to vector<16x16xf32>
    %356 = arith.subf %354, %355 : vector<16x16xf32>
    %357 = math.absf %356 : vector<16x16xf32>
    %cst_106 = arith.constant 1.000000e+00 : f32
    %358 = vector.broadcast %cst_106 : f32 to vector<16x16xf32>
    %359 = arith.minimumf %357, %358 : vector<16x16xf32>
    %cst_107 = arith.constant 5.000000e-01 : f32
    %360 = vector.broadcast %cst_107 : f32 to vector<16x16xf32>
    %361 = arith.mulf %360, %359 : vector<16x16xf32>
    %362 = arith.subf %357, %361 : vector<16x16xf32>
    %363 = arith.mulf %359, %362 : vector<16x16xf32>
    %364 = arith.addf %350, %363 : vector<16x16xf32>
    %365 = vector.extract_strided_slice %1 {offsets = [0, 25], sizes = [16, 1], strides = [1, 1]} : vector<16x32xf32> to vector<16x1xf32>
    %c0_108 = arith.constant 0 : index
    %c25 = arith.constant 25 : index
    %c0_109 = arith.constant 0 : index
    %366 = vector.load %arg3[%c0_108, %c25, %c0_109] : memref<1x32x16xf32, #tpu.memory_space<vmem>>, vector<1x1x16xf32>
    %367 = vector.shape_cast %366 : vector<1x1x16xf32> to vector<1x16xf32>
    %368 = vector.broadcast %365 : vector<16x1xf32> to vector<16x16xf32>
    %369 = vector.broadcast %367 : vector<1x16xf32> to vector<16x16xf32>
    %370 = arith.subf %368, %369 : vector<16x16xf32>
    %371 = math.absf %370 : vector<16x16xf32>
    %cst_110 = arith.constant 1.000000e+00 : f32
    %372 = vector.broadcast %cst_110 : f32 to vector<16x16xf32>
    %373 = arith.minimumf %371, %372 : vector<16x16xf32>
    %cst_111 = arith.constant 5.000000e-01 : f32
    %374 = vector.broadcast %cst_111 : f32 to vector<16x16xf32>
    %375 = arith.mulf %374, %373 : vector<16x16xf32>
    %376 = arith.subf %371, %375 : vector<16x16xf32>
    %377 = arith.mulf %373, %376 : vector<16x16xf32>
    %378 = arith.addf %364, %377 : vector<16x16xf32>
    %379 = vector.extract_strided_slice %1 {offsets = [0, 26], sizes = [16, 1], strides = [1, 1]} : vector<16x32xf32> to vector<16x1xf32>
    %c0_112 = arith.constant 0 : index
    %c26 = arith.constant 26 : index
    %c0_113 = arith.constant 0 : index
    %380 = vector.load %arg3[%c0_112, %c26, %c0_113] : memref<1x32x16xf32, #tpu.memory_space<vmem>>, vector<1x1x16xf32>
    %381 = vector.shape_cast %380 : vector<1x1x16xf32> to vector<1x16xf32>
    %382 = vector.broadcast %379 : vector<16x1xf32> to vector<16x16xf32>
    %383 = vector.broadcast %381 : vector<1x16xf32> to vector<16x16xf32>
    %384 = arith.subf %382, %383 : vector<16x16xf32>
    %385 = math.absf %384 : vector<16x16xf32>
    %cst_114 = arith.constant 1.000000e+00 : f32
    %386 = vector.broadcast %cst_114 : f32 to vector<16x16xf32>
    %387 = arith.minimumf %385, %386 : vector<16x16xf32>
    %cst_115 = arith.constant 5.000000e-01 : f32
    %388 = vector.broadcast %cst_115 : f32 to vector<16x16xf32>
    %389 = arith.mulf %388, %387 : vector<16x16xf32>
    %390 = arith.subf %385, %389 : vector<16x16xf32>
    %391 = arith.mulf %387, %390 : vector<16x16xf32>
    %392 = arith.addf %378, %391 : vector<16x16xf32>
    %393 = vector.extract_strided_slice %1 {offsets = [0, 27], sizes = [16, 1], strides = [1, 1]} : vector<16x32xf32> to vector<16x1xf32>
    %c0_116 = arith.constant 0 : index
    %c27 = arith.constant 27 : index
    %c0_117 = arith.constant 0 : index
    %394 = vector.load %arg3[%c0_116, %c27, %c0_117] : memref<1x32x16xf32, #tpu.memory_space<vmem>>, vector<1x1x16xf32>
    %395 = vector.shape_cast %394 : vector<1x1x16xf32> to vector<1x16xf32>
    %396 = vector.broadcast %393 : vector<16x1xf32> to vector<16x16xf32>
    %397 = vector.broadcast %395 : vector<1x16xf32> to vector<16x16xf32>
    %398 = arith.subf %396, %397 : vector<16x16xf32>
    %399 = math.absf %398 : vector<16x16xf32>
    %cst_118 = arith.constant 1.000000e+00 : f32
    %400 = vector.broadcast %cst_118 : f32 to vector<16x16xf32>
    %401 = arith.minimumf %399, %400 : vector<16x16xf32>
    %cst_119 = arith.constant 5.000000e-01 : f32
    %402 = vector.broadcast %cst_119 : f32 to vector<16x16xf32>
    %403 = arith.mulf %402, %401 : vector<16x16xf32>
    %404 = arith.subf %399, %403 : vector<16x16xf32>
    %405 = arith.mulf %401, %404 : vector<16x16xf32>
    %406 = arith.addf %392, %405 : vector<16x16xf32>
    %407 = vector.extract_strided_slice %1 {offsets = [0, 28], sizes = [16, 1], strides = [1, 1]} : vector<16x32xf32> to vector<16x1xf32>
    %c0_120 = arith.constant 0 : index
    %c28 = arith.constant 28 : index
    %c0_121 = arith.constant 0 : index
    %408 = vector.load %arg3[%c0_120, %c28, %c0_121] : memref<1x32x16xf32, #tpu.memory_space<vmem>>, vector<1x1x16xf32>
    %409 = vector.shape_cast %408 : vector<1x1x16xf32> to vector<1x16xf32>
    %410 = vector.broadcast %407 : vector<16x1xf32> to vector<16x16xf32>
    %411 = vector.broadcast %409 : vector<1x16xf32> to vector<16x16xf32>
    %412 = arith.subf %410, %411 : vector<16x16xf32>
    %413 = math.absf %412 : vector<16x16xf32>
    %cst_122 = arith.constant 1.000000e+00 : f32
    %414 = vector.broadcast %cst_122 : f32 to vector<16x16xf32>
    %415 = arith.minimumf %413, %414 : vector<16x16xf32>
    %cst_123 = arith.constant 5.000000e-01 : f32
    %416 = vector.broadcast %cst_123 : f32 to vector<16x16xf32>
    %417 = arith.mulf %416, %415 : vector<16x16xf32>
    %418 = arith.subf %413, %417 : vector<16x16xf32>
    %419 = arith.mulf %415, %418 : vector<16x16xf32>
    %420 = arith.addf %406, %419 : vector<16x16xf32>
    %421 = vector.extract_strided_slice %1 {offsets = [0, 29], sizes = [16, 1], strides = [1, 1]} : vector<16x32xf32> to vector<16x1xf32>
    %c0_124 = arith.constant 0 : index
    %c29 = arith.constant 29 : index
    %c0_125 = arith.constant 0 : index
    %422 = vector.load %arg3[%c0_124, %c29, %c0_125] : memref<1x32x16xf32, #tpu.memory_space<vmem>>, vector<1x1x16xf32>
    %423 = vector.shape_cast %422 : vector<1x1x16xf32> to vector<1x16xf32>
    %424 = vector.broadcast %421 : vector<16x1xf32> to vector<16x16xf32>
    %425 = vector.broadcast %423 : vector<1x16xf32> to vector<16x16xf32>
    %426 = arith.subf %424, %425 : vector<16x16xf32>
    %427 = math.absf %426 : vector<16x16xf32>
    %cst_126 = arith.constant 1.000000e+00 : f32
    %428 = vector.broadcast %cst_126 : f32 to vector<16x16xf32>
    %429 = arith.minimumf %427, %428 : vector<16x16xf32>
    %cst_127 = arith.constant 5.000000e-01 : f32
    %430 = vector.broadcast %cst_127 : f32 to vector<16x16xf32>
    %431 = arith.mulf %430, %429 : vector<16x16xf32>
    %432 = arith.subf %427, %431 : vector<16x16xf32>
    %433 = arith.mulf %429, %432 : vector<16x16xf32>
    %434 = arith.addf %420, %433 : vector<16x16xf32>
    %435 = vector.extract_strided_slice %1 {offsets = [0, 30], sizes = [16, 1], strides = [1, 1]} : vector<16x32xf32> to vector<16x1xf32>
    %c0_128 = arith.constant 0 : index
    %c30 = arith.constant 30 : index
    %c0_129 = arith.constant 0 : index
    %436 = vector.load %arg3[%c0_128, %c30, %c0_129] : memref<1x32x16xf32, #tpu.memory_space<vmem>>, vector<1x1x16xf32>
    %437 = vector.shape_cast %436 : vector<1x1x16xf32> to vector<1x16xf32>
    %438 = vector.broadcast %435 : vector<16x1xf32> to vector<16x16xf32>
    %439 = vector.broadcast %437 : vector<1x16xf32> to vector<16x16xf32>
    %440 = arith.subf %438, %439 : vector<16x16xf32>
    %441 = math.absf %440 : vector<16x16xf32>
    %cst_130 = arith.constant 1.000000e+00 : f32
    %442 = vector.broadcast %cst_130 : f32 to vector<16x16xf32>
    %443 = arith.minimumf %441, %442 : vector<16x16xf32>
    %cst_131 = arith.constant 5.000000e-01 : f32
    %444 = vector.broadcast %cst_131 : f32 to vector<16x16xf32>
    %445 = arith.mulf %444, %443 : vector<16x16xf32>
    %446 = arith.subf %441, %445 : vector<16x16xf32>
    %447 = arith.mulf %443, %446 : vector<16x16xf32>
    %448 = arith.addf %434, %447 : vector<16x16xf32>
    %449 = vector.extract_strided_slice %1 {offsets = [0, 31], sizes = [16, 1], strides = [1, 1]} : vector<16x32xf32> to vector<16x1xf32>
    %c0_132 = arith.constant 0 : index
    %c31 = arith.constant 31 : index
    %c0_133 = arith.constant 0 : index
    %450 = vector.load %arg3[%c0_132, %c31, %c0_133] : memref<1x32x16xf32, #tpu.memory_space<vmem>>, vector<1x1x16xf32>
    %451 = vector.shape_cast %450 : vector<1x1x16xf32> to vector<1x16xf32>
    %452 = vector.broadcast %449 : vector<16x1xf32> to vector<16x16xf32>
    %453 = vector.broadcast %451 : vector<1x16xf32> to vector<16x16xf32>
    %454 = arith.subf %452, %453 : vector<16x16xf32>
    %455 = math.absf %454 : vector<16x16xf32>
    %cst_134 = arith.constant 1.000000e+00 : f32
    %456 = vector.broadcast %cst_134 : f32 to vector<16x16xf32>
    %457 = arith.minimumf %455, %456 : vector<16x16xf32>
    %cst_135 = arith.constant 5.000000e-01 : f32
    %458 = vector.broadcast %cst_135 : f32 to vector<16x16xf32>
    %459 = arith.mulf %458, %457 : vector<16x16xf32>
    %460 = arith.subf %455, %459 : vector<16x16xf32>
    %461 = arith.mulf %457, %460 : vector<16x16xf32>
    %462 = arith.addf %448, %461 : vector<16x16xf32>
    %c0_136 = arith.constant 0 : index
    %c0_137 = arith.constant 0 : index
    %463 = vector.load %arg5[%c0_136, %c0_137] : memref<1x16xi32, #tpu.memory_space<vmem>>, vector<1x16xi32>
    %464 = vector.broadcast %2 : vector<16x1xi32> to vector<16x16xi32>
    %465 = vector.broadcast %463 : vector<1x16xi32> to vector<16x16xi32>
    %466 = arith.cmpi eq, %464, %465 : vector<16x16xi32>
    %467 = vector.shape_cast %462 : vector<16x16xf32> to vector<1x16x16xf32>
    %cst_138 = arith.constant dense<0.000000e+00> : vector<1xf32>
    %468 = vector.multi_reduction <add>, %467, %cst_138 [1, 2] : vector<1x16x16xf32> to vector<1xf32>
    %469 = vector.shape_cast %468 : vector<1xf32> to vector<1x1x1xf32>
    %470 = vector.extract %469[0, 0, 0] : f32 from vector<1x1x1xf32>
    %cst_139 = arith.constant 0.000000e+00 : f32
    %471 = arith.addf %cst_139, %470 : f32
    %cst_140 = arith.constant 0.000000e+00 : f32
    %472 = vector.broadcast %cst_140 : f32 to vector<16x16xf32>
    %473 = arith.select %466, %462, %472 : vector<16x16xi1>, vector<16x16xf32>
    %474 = vector.shape_cast %473 : vector<16x16xf32> to vector<1x16x16xf32>
    %cst_141 = arith.constant dense<0.000000e+00> : vector<1xf32>
    %475 = vector.multi_reduction <add>, %474, %cst_141 [1, 2] : vector<1x16x16xf32> to vector<1xf32>
    %476 = vector.shape_cast %475 : vector<1xf32> to vector<1x1x1xf32>
    %477 = vector.extract %476[0, 0, 0] : f32 from vector<1x1x1xf32>
    %cst_142 = arith.constant 0.000000e+00 : f32
    %478 = arith.addf %cst_142, %477 : f32
    %479 = tpu.iota {dimensions = array<i32: 0>} : vector<8x128xi32>
    %c0_i32 = arith.constant 0 : i32
    %480 = vector.broadcast %c0_i32 : i32 to vector<8x128xi32>
    %481 = arith.cmpi eq, %479, %480 : vector<8x128xi32>
    %cst_143 = arith.constant 3.125000e-02 : f32
    %482 = arith.mulf %478, %cst_143 : f32
    %c1_i32 = arith.constant 1 : i32
    %483 = vector.broadcast %c1_i32 : i32 to vector<8x128xi32>
    %484 = arith.cmpi eq, %479, %483 : vector<8x128xi32>
    %cst_144 = arith.constant 3.125000e-02 : f32
    %485 = arith.mulf %471, %cst_144 : f32
    %c2_i32 = arith.constant 2 : i32
    %486 = vector.broadcast %c2_i32 : i32 to vector<8x128xi32>
    %487 = arith.cmpi eq, %479, %486 : vector<8x128xi32>
    %cst_145 = arith.constant 0.000000e+00 : f32
    %488 = vector.broadcast %13 : f32 to vector<8x128xf32>
    %489 = vector.broadcast %cst_145 : f32 to vector<8x128xf32>
    %490 = arith.select %487, %488, %489 : vector<8x128xi1>, vector<8x128xf32>
    %491 = vector.broadcast %485 : f32 to vector<8x128xf32>
    %492 = arith.select %484, %491, %490 : vector<8x128xi1>, vector<8x128xf32>
    %493 = vector.broadcast %482 : f32 to vector<8x128xf32>
    %494 = arith.select %481, %493, %492 : vector<8x128xi1>, vector<8x128xf32>
    %c0_146 = arith.constant 0 : index
    %c0_147 = arith.constant 0 : index
    %c0_148 = arith.constant 0 : index
    %495 = vector.load %arg6[%c0_146, %c0_147, %c0_148] : memref<1x8x128xf32, #tpu.memory_space<vmem>>, vector<1x8x128xf32>
    %496 = vector.shape_cast %495 : vector<1x8x128xf32> to vector<8x128xf32>
    %497 = vector.shape_cast %494 : vector<8x128xf32> to vector<1x8x128xf32>
    tpu.vector_store %arg6[%c0_146, %c0_147, %c0_148], %497 {strides = array<i32>} : memref<1x8x128xf32, #tpu.memory_space<vmem>>, vector<1x8x128xf32>,
    return
  }
  func.func @transform_0(%arg0: i32, %arg1: i32) -> (i32, i32, i32) {
    %c0_i32 = arith.constant 0 : i32
    %c0_i32_0 = arith.constant 0 : i32
    return %arg0, %arg1, %c0_i32 : i32, i32, i32
  }
  func.func @transform_1(%arg0: i32, %arg1: i32) -> (i32, i32, i32) {
    %c0_i32 = arith.constant 0 : i32
    %c0_i32_0 = arith.constant 0 : i32
    %c0_i32_1 = arith.constant 0 : i32
    return %arg0, %c0_i32, %c0_i32_0 : i32, i32, i32
  }
  func.func @transform_2(%arg0: i32, %arg1: i32) -> (i32, i32) {
    %c0_i32 = arith.constant 0 : i32
    %c0_i32_0 = arith.constant 0 : i32
    return %arg1, %c0_i32 : i32, i32
  }
  func.func @transform_3(%arg0: i32, %arg1: i32) -> (i32, i32) {
    %c0_i32 = arith.constant 0 : i32
    %c0_i32_0 = arith.constant 0 : i32
    %c0_i32_1 = arith.constant 0 : i32
    return %c0_i32, %c0_i32_0 : i32, i32
  }
  func.func @transform_4(%arg0: i32, %arg1: i32) -> (i32, i32, i32) {
    %c0_i32 = arith.constant 0 : i32
    %c0_i32_0 = arith.constant 0 : i32
    return %arg0, %arg1, %c0_i32 : i32, i32, i32
  }
}

</mosaic_0001>

<bundles_post_ra>
// kernel: tpu_custom_call.1
= control target key start
LH: loop header
LB: loop body
LE: loop exit
PB: predicated region body
PF: predicated region fallthrough
CT: control target
= control target key end

     0   :  { %9 = vsyncpa [#allocation3], 0  ;;  %s2002_s0 = inlined_call_operand.vmem [shape: f32[3,16,32], index: 0, kind: input, shape index: {}]   ;;  %s2003_s1 = inlined_call_operand.vmem [shape: f32[3,32,16], index: 1, kind: input, shape index: {}]   ;;  %s2004_s2 = inlined_call_operand.vmem [shape: s32[16,1], index: 2, kind: input, shape index: {}]   ;;  %s2005_s3 = inlined_call_operand.vmem [shape: s32[1,16], index: 3, kind: input, shape index: {}]   ;;  %s2006_s4 = inlined_call_operand.hbm [shape: f32[3,8,128], index: 4, kind: output, shape index: {}]  }
   0x1   :  { %11 = vsyncpa [#allocation3 + $0x1], 0  ;;  %s1690_s15 = smov 0   ;;  %s1692_s16 = smov 0  }
   0x2   :  { %s1694_s17 = smov 0   ;;  %s1696_s18 = smov 0  }
   0x3   :  { %s1698_s19 = smov 0   ;;  %s1700_s20 = smov 0  }
   0x4 LB: > { %s1350_s21 = sadd.s32 4294967295, %s1630_s20   ;;  %s1351_s22 = sadd.s32 4294967294, %s1630_s20   ;;  %s1630_s20 = sphi %s1700_s20, %s17_s20   ;;  %s1626_s19 = sphi %s1698_s19, %s2013_s19   ;;  %s1622_s18 = sphi %s1696_s18, %s2012_s18   ;;  %s1618_s17 = sphi %s1694_s17, %s2011_s17   ;;  %s1614_s16 = sphi %s1692_s16, %s2010_s16   ;;  %s1610_s15 = sphi %s1690_s15, %s2009_s15  }
   0x5   : > { %s29_s23 = sadd.s32 1, %s1626_s19  ;;  %s139_s24 = sadd.s32 1, %s1618_s17 }
   0x6   : > { %p31_p0 = scmp.ge.s32.totalorder %s29_s23, 3  ;;  %p149_p1 = scmp.ne.s32.totalorder %s1618_s17, %s1614_s16 }
   0x7   : > { %p150_p2 = scmp.eq.s32.totalorder %s1350_s21, 2  ;;  %p155_p3 = scmp.ne.s32.totalorder %s1614_s16, %s1610_s15 }
   0x8   : > { %s2015_s23 = smov (%p31_p0, %s29_s23), 0  ;;  %p156_p5 = scmp.eq.s32.totalorder %s1351_s22, 2 }
   0x9   : > { %p1730_p4 = por %p150_p2, %p149_p1  ;;  %s134_s26 = ssub.s32 %s1626_s19, %s2015_s23 }
   0xa   : > { %p1355_p6 = scmp.ge.s32.totalorder %s1630_s20, 1  ;;  %p137_p7 = scmp.eq.s32.totalorder %s134_s26, 0 }
   0xb   : > { %p1737_p8 = por %p156_p5, %p155_p3  ;;  %p207_p9 = scmp.lt.s32.totalorder %s1630_s20, 4 }
   0xc   : > { %s1743_s28 = scalar_select %p137_p7, %s1618_s17, %s139_s24  }
   0xd   : > { %p208_p10 = pnand %p1355_p6, %p207_p9 }
   0xe   : > { %p248_p11 = scmp.lt.s32.totalorder (!%p208_p10), %s1622_s18, 2  ;;  %v1632_v0 = vmov (!%p208_p10), 0   ;;  %vm274_vm0 = vcmask (!%p208_p10), 261120   ;;  %v1633_v6 = vmov (!%p208_p10), 1   ;;  %v1634_v8 = vmov (!%p208_p10), 2   ;;  %v270_v45 = vld [vmem:[%s2004_s2] sm:$0xff] (!%p208_p10) }
   0xf   : > { %211 = sbr.rel (%p208_p10) target bundleno = 651 (0x28b), region = 36  ;;  %1495 = vset.pattern.permute.xlu1 (!%p208_p10), %v1632_v0  ;;  %1496 = vset.pattern.permute.xlu0 (!%p208_p10), %v1632_v0  ;;  %v1635_v9 = vmov (!%p208_p10), 3   ;;  %v1636_v10 = vmov (!%p208_p10), 4   ;;  %v1637_v11 = vmov (!%p208_p10), 5   ;;  %v1638_v12 = vmov (!%p208_p10), 6   ;;  %s244_s26 = sand.u32 (!%p208_p10), 1, %s1614_s16  }
  0x10   : > { %v1639_v13 = vmov (!%p208_p10), 8   ;;  %v1640_v14 = vmov (!%p208_p10), 9   ;;  %v1641_v15 = vmov (!%p208_p10), 7   ;;  %v1642_v16 = vmov (!%p208_p10), 11   ;;  %s1397_s5 = sshll.u32 (!%p208_p10), %s1622_s18, 7  ;;  %s1664_s22 = smov (!%p208_p10), [#allocation2]  }
  0x11   : > { %v1643_v17 = vmov (!%p208_p10), 12   ;;  %v1644_v18 = vmov (!%p208_p10), 14   ;;  %v1645_v19 = vmov (!%p208_p10), 15   ;;  %v1646_v20 = vmov (!%p208_p10), 10   ;;  %s1955_s14 = scalar_lea.hbm (!%p208_p10), %s2006_s4, %s1397_s5  ;;  %s1556_s24 = sshll.u32 (!%p208_p10), %s1664_s22, 4  ;;  %s1557_s24 = int_to_ptr.vmem [resolvable:$false] %s1556_s24 }
  0x12   : > { %v1647_v21 = vmov (!%p208_p10), 17   ;;  %v1648_v22 = vmov (!%p208_p10), 18   ;;  %v1649_v23 = vmov (!%p208_p10), 20   ;;  %v1650_v24 = vmov (!%p208_p10), 13  }
  0x13   : > { %v1651_v25 = vmov (!%p208_p10), 21   ;;  %v1652_v26 = vmov (!%p208_p10), 23   ;;  %v1653_v27 = vmov (!%p208_p10), 24   ;;  %v1654_v28 = vmov (!%p208_p10), 26  }
  0x14   : > { %v1655_v29 = vmov (!%p208_p10), 16   ;;  %v1656_v30 = vmov (!%p208_p10), 27   ;;  %v1657_v31 = vmov (!%p208_p10), 29   ;;  %v1658_v32 = vmov (!%p208_p10), 30  }
  0x15   : > { %v1659_v34 = vmov (!%p208_p10), 19   ;;  %v1660_v59 = vmov (!%p208_p10), 22   ;;  %vm299_vm5 = vcmask (!%p208_p10), 7168   ;;  %vm1191_vm8 = vcmask (!%p208_p10), 130048  }
  0x16   : > { %s1749_s29 = scalar_select %p248_p11, %s1622_s18, 2 }
  0x17   : > { %s1235_s18 = scalar_lea.sflag [#allocation3], %s244_s26 }
  0x18   : > { %s1400_s30 = sshll.u32 %s1749_s29, 4  ;;  %s1401_s8 = sshll.u32 %s1749_s29, 5 }
  0x19   : > { %s255_s7 = scalar_lea.vmem %s2002_s0, %s1400_s30  ;;  %s1819_s11 = scalar_lea.vmem %s2003_s1, %s1401_s8 }
  0x1a   : > { %v1755_v1 = vld [vmem:[%s255_s7] sm:$0xff]  ;;  %v1757_v2 = vld [vmem:[%s255_s7 + $0x8] sm:$0xff]  ;;  %s1356_s29 = sshll.u32 %s244_s26, 3 }
  0x1b   : > { %315 = vperm.xlu1 %1495, %v1755_v1   ;;  %v272_v3 = vmul.f32 %v1755_v1, %v1755_v1  ;;  %v273_v4 = vmul.f32 %v1757_v2, %v1757_v2  ;;  %v1823_v33 = vld [vmem:[%s1819_s11] ss:$0 sm:$0xff]  ;;  %v1364_v38 = vld [vmem:[%s1819_s11 + $0x1] ss:$0 sm:$0xff]  ;;  %v1365_v50 = vld [vmem:[%s1819_s11 + $0x2] ss:$0 sm:$0xff] }
  0x1c   : > { %s246_s7 = scalar_lea.vmem [#allocation2], %s1356_s29  ;;  %s1558_s29 = scalar_lea.vmem %s1557_s24, 256 }
  0x1d   : > { %v275_v5 = vsel %vm274_vm0, %v272_v3, 0.0  ;;  %v278_v7 = vsel %vm274_vm0, %v273_v4, 0.0  ;;  %v1366_v3 = vld [vmem:[%s1819_s11 + $0x3] ss:$0 sm:$0xff]  ;;  %s1249_s8 = sshll.u32 %s246_s7, 4  ;;  %s1957_s8 = int_to_ptr.vmem [resolvable:$true] %s1249_s8 }
  0x1e   : > { %276 = vadd.xlane.f32.xlu0 %v275_v5  ;;  %s1552_s21 = scalar_lea.vmem %s1957_s8, 128  ;;  %p1559_p1 = scmp.lt.s32.totalorder %s1957_s8, %s1557_s24 }
  0x1f   : > { %1497 = vset.pattern.permute.xlu1 %v1633_v6  ;;  %p1553_p12 = scmp.ne.s32.totalorder %s1957_s8, %s1552_s21  ;;  %p1560_p2 = scmp.lt.s32.totalorder %s1558_s29, %s1552_s21 }
  0x20   : > { %343 = vperm.xlu1 %1497, %v1755_v1  }
  0x21   : > { %p1554_p13 = pnand %p1553_p12, %p1730_p4  ;;  %p1561_p3 = por %p1560_p2, %p1559_p1 }
  0x22   : > { %279 = vadd.xlane.f32.xlu0 %v278_v7 }
  0x23   : > { %p1555_p0 = pneg %p1554_p13 }
  0x24   : > { %347 = vperm.xlu1 %1497, %v1757_v2  }
  0x25   : > { %p1562_p5 = pnand %p1561_p3, %p1555_p0 }
  0x28   : > { %1498 = vset.pattern.permute.xlu1 %v1634_v8 }
  0x29   : > { %370 = vperm.xlu1 %1498, %v1755_v1  }
  0x2d   : > { %374 = vperm.xlu1 %1498, %v1757_v2  }
  0x31   : > { %1499 = vset.pattern.permute.xlu1 %v1635_v9 }
  0x32   : > { %397 = vperm.xlu1 %1499, %v1755_v1  }
  0x36   : > { %401 = vperm.xlu1 %1499, %v1757_v2  }
  0x38   : > { %320 = vperm.xlu0 %1496, %v1757_v2  }
  0x3a   : > { %1500 = vset.pattern.permute.xlu1 %v1636_v10 }
  0x3b   : > { %424 = vperm.xlu1 %1500, %v1755_v1  }
  0x3c   : > { %1501 = vset.pattern.permute.xlu0 %v1637_v11 }
  0x3d   : > { %451 = vperm.xlu0 %1501, %v1755_v1  }
  0x3f   : > { %428 = vperm.xlu1 %1500, %v1757_v2  }
  0x41   : > { %1504 = vset.pattern.permute.xlu0 %v1638_v12 }
  0x42   : > { %482 = vperm.xlu0 %1504, %v1757_v2  }
  0x43   : > { %1502 = vset.pattern.permute.xlu1 %v1637_v11 }
  0x44   : > { %455 = vperm.xlu1 %1502, %v1757_v2  }
  0x46   : > { %1506 = vset.pattern.permute.xlu0 %v1639_v13 }
  0x47   : > { %532 = vperm.xlu0 %1506, %v1755_v1  }
  0x48   : > { %1503 = vset.pattern.permute.xlu1 %v1638_v12 }
  0x49   : > { %478 = vperm.xlu1 %1503, %v1755_v1  }
  0x4b   : > { %1509 = vset.pattern.permute.xlu0 %v1640_v14 }
  0x4c   : > { %563 = vperm.xlu0 %1509, %v1757_v2  }
  0x4d   : > { %1505 = vset.pattern.permute.xlu1 %v1641_v15 }
  0x4e   : > { %505 = vperm.xlu1 %1505, %v1755_v1  }
  0x50   : > { %1511 = vset.pattern.permute.xlu0 %v1642_v16 }
  0x51   : > { %613 = vperm.xlu0 %1511, %v1755_v1  }
  0x52   : > { %509 = vperm.xlu1 %1505, %v1757_v2  }
  0x55   : > { %1514 = vset.pattern.permute.xlu0 %v1643_v17 }
  0x56   : > { %1507 = vset.pattern.permute.xlu1 %v1639_v13  ;;  %644 = vperm.xlu0 %1514, %v1757_v2  }
  0x57   : > { %536 = vperm.xlu1 %1507, %v1757_v2  }
  0x5a   : > { %1516 = vset.pattern.permute.xlu0 %v1644_v18 }
  0x5b   : > { %1508 = vset.pattern.permute.xlu1 %v1640_v14  ;;  %694 = vperm.xlu0 %1516, %v1755_v1  }
  0x5c   : > { %559 = vperm.xlu1 %1508, %v1755_v1  }
  0x5f   : > { %1519 = vset.pattern.permute.xlu0 %v1645_v19 }
  0x60   : > { %1510 = vset.pattern.permute.xlu1 %v1646_v20  ;;  %725 = vperm.xlu0 %1519, %v1757_v2  }
  0x61   : > { %586 = vperm.xlu1 %1510, %v1755_v1  }
  0x64   : > { %1521 = vset.pattern.permute.xlu0 %v1647_v21 }
  0x65   : > { %590 = vperm.xlu1 %1510, %v1757_v2   ;;  %775 = vperm.xlu0 %1521, %v1755_v1  }
  0x69   : > { %1512 = vset.pattern.permute.xlu1 %v1642_v16  ;;  %1524 = vset.pattern.permute.xlu0 %v1648_v22 }
  0x6a   : > { %617 = vperm.xlu1 %1512, %v1757_v2   ;;  %806 = vperm.xlu0 %1524, %v1757_v2  }
  0x6e   : > { %1513 = vset.pattern.permute.xlu1 %v1643_v17  ;;  %1526 = vset.pattern.permute.xlu0 %v1649_v23 }
  0x6f   : > { %640 = vperm.xlu1 %1513, %v1755_v1   ;;  %856 = vperm.xlu0 %1526, %v1755_v1  }
  0x73   : > { %1515 = vset.pattern.permute.xlu1 %v1650_v24  ;;  %1529 = vset.pattern.permute.xlu0 %v1651_v25 }
  0x74   : > { %667 = vperm.xlu1 %1515, %v1755_v1   ;;  %887 = vperm.xlu0 %1529, %v1757_v2  }
  0x78   : > { %671 = vperm.xlu1 %1515, %v1757_v2   ;;  %1531 = vset.pattern.permute.xlu0 %v1652_v26 }
  0x79   : > { %937 = vperm.xlu0 %1531, %v1755_v1  }
  0x7c   : > { %1517 = vset.pattern.permute.xlu1 %v1644_v18 }
  0x7d   : > { %698 = vperm.xlu1 %1517, %v1757_v2   ;;  %1534 = vset.pattern.permute.xlu0 %v1653_v27 }
  0x7e   : > { %968 = vperm.xlu0 %1534, %v1757_v2  }
  0x81   : > { %1518 = vset.pattern.permute.xlu1 %v1645_v19 }
  0x82   : > { %721 = vperm.xlu1 %1518, %v1755_v1   ;;  %1536 = vset.pattern.permute.xlu0 %v1654_v28 }
  0x83   : > { %1018 = vperm.xlu0 %1536, %v1755_v1  }
  0x86   : > { %1520 = vset.pattern.permute.xlu1 %v1655_v29 }
  0x87   : > { %748 = vperm.xlu1 %1520, %v1755_v1   ;;  %1539 = vset.pattern.permute.xlu0 %v1656_v30 }
  0x88   : > { %1049 = vperm.xlu0 %1539, %v1757_v2  }
  0x8b   : > { %752 = vperm.xlu1 %1520, %v1757_v2  }
  0x8c   : > { %1541 = vset.pattern.permute.xlu0 %v1657_v31 }
  0x8d   : > { %1099 = vperm.xlu0 %1541, %v1755_v1  }
  0x8f   : > { %1522 = vset.pattern.permute.xlu1 %v1647_v21 }
  0x90   : > { %779 = vperm.xlu1 %1522, %v1757_v2  }
  0x91   : > { %1544 = vset.pattern.permute.xlu0 %v1658_v32 }
  0x92   : > { %1130 = vperm.xlu0 %1544, %v1757_v2  }
  0x94   : > { %1523 = vset.pattern.permute.xlu1 %v1648_v22  ;;  %v1367_v22 = vld [vmem:[%s1819_s11 + $0x4] ss:$0 sm:$0xff] }
  0x95   : > { %802 = vperm.xlu1 %1523, %v1755_v1  }
  0x96   : > { %1546 = vset.pattern.permute.xlu0 %v1632_v0 }
  0x97   : > { %1180 = vperm.xlu0 %1546, %v270_v45  }
  0x99   : > { %1525 = vset.pattern.permute.xlu1 %v1659_v34  ;;  %v1368_v34 = vld [vmem:[%s1819_s11 + $0x5] ss:$0 sm:$0xff] }
  0x9a   : > { %829 = vperm.xlu1 %1525, %v1755_v1   ;;  %v316_v35 = vpop.permute.xlu1 %315 }
  0x9b   : > { %v327_v36 = vsub.f32 %v316_v35, %v1823_v33 }
  0x9d   : > { %v329_v37 = vand.u32 2147483647, %v327_v36 }
  0x9e   : > { %833 = vperm.xlu1 %1525, %v1757_v2  }
  0x9f   : > { %v331_v39 = vmin.f32 %v329_v37, 1.0  ;;  %v344_v40 = vpop.permute.xlu1 %343 }
  0xa0   : > { %v354_v41 = vsub.f32 %v344_v40, %v1364_v38 }
  0xa1   : > { %v333_v42 = vmul.f32 0.5, %v331_v39 }
  0xa2   : > { %v356_v43 = vand.u32 2147483647, %v354_v41  ;;  %1527 = vset.pattern.permute.xlu1 %v1649_v23 }
  0xa3   : > { %860 = vperm.xlu1 %1527, %v1757_v2   ;;  %v348_v44 = vpop.permute.xlu1 %347  ;;  %v335_v48 = vsub.f32 %v329_v37, %v333_v42 }
  0xa4   : > { %v358_v46 = vmin.f32 %v356_v43, 1.0  ;;  %v355_v47 = vsub.f32 %v348_v44, %v1364_v38 }
  0xa5   : > { %v337_v54 = vmul.f32 %v335_v48, %v331_v39  ;;  %v1661_v48 = vmov 25  }
  0xa6   : > { %v360_v49 = vmul.f32 0.5, %v358_v46  ;;  %v357_v7 = vand.u32 2147483647, %v355_v47 }
  0xa7   : > { %1528 = vset.pattern.permute.xlu1 %v1651_v25 }
  0xa8   : > { %v362_v51 = vsub.f32 %v356_v43, %v360_v49  ;;  %883 = vperm.xlu1 %1528, %v1755_v1   ;;  %v371_v52 = vpop.permute.xlu1 %370  ;;  %v359_v14 = vmin.f32 %v357_v7, 1.0  ;;  %v1369_v49 = vld [vmem:[%s1819_s11 + $0x6] ss:$0 sm:$0xff] }
  0xa9   : > { %v381_v53 = vsub.f32 %v371_v52, %v1365_v50 }
  0xaa   : > { %v364_v55 = vmul.f32 %v362_v51, %v358_v46  ;;  %v361_v23 = vmul.f32 0.5, %v359_v14 }
  0xab   : > { %v383_v56 = vand.u32 2147483647, %v381_v53  ;;  %v1835_v57 = vpop.xlane.xlu0 %276 }
  0xac   : > { %v366_v58 = vadd.f32 %v364_v55, %v337_v54  ;;  %1530 = vset.pattern.permute.xlu1 %v1660_v59  ;;  %v375_v60 = vpop.permute.xlu1 %374  ;;  %1548 = vrsqrt.f32 %v1835_v57  ;;  %vm283_vm1 = vcmp.eq.f32.partialorder %v1835_v57, inf  ;;  %vm285_vm3 = vcmp.eq.f32.partialorder %v1835_v57, 0.0 }
  0xad   : > { %v385_v61 = vmin.f32 %v383_v56, 1.0  ;;  %v382_v62 = vsub.f32 %v375_v60, %v1365_v50  ;;  %910 = vperm.xlu1 %1530, %v1755_v1  }
  0xaf   : > { %v387_v63 = vmul.f32 0.5, %v385_v61  ;;  %v1840_v6 = vpop.xlane.xlu0 %279  ;;  %v384_v10 = vand.u32 2147483647, %v382_v62 }
  0xb0   : > { %1550 = vrsqrt.f32 %v1840_v6  ;;  %vm290_vm2 = vcmp.eq.f32.partialorder %v1840_v6, inf  ;;  %vm292_vm4 = vcmp.eq.f32.partialorder %v1840_v6, 0.0 }
  0xb1   : > { %v389_v4 = vsub.f32 %v383_v56, %v387_v63  ;;  %914 = vperm.xlu1 %1530, %v1757_v2   ;;  %v398_v5 = vpop.permute.xlu1 %397  ;;  %v386_v18 = vmin.f32 %v384_v10, 1.0 }
  0xb2   : > { %v408_v8 = vsub.f32 %v398_v5, %v1366_v3 }
  0xb3   : > { %v391_v9 = vmul.f32 %v389_v4, %v385_v61  ;;  %v388_v36 = vmul.f32 0.5, %v386_v18 }
  0xb4   : > { %v410_v11 = vand.u32 2147483647, %v408_v8 }
  0xb5   : > { %v393_v12 = vadd.f32 %v391_v9, %v366_v58  ;;  %1532 = vset.pattern.permute.xlu1 %v1652_v26  ;;  %v402_v13 = vpop.permute.xlu1 %401  ;;  %v390_v50 = vsub.f32 %v384_v10, %v388_v36  ;;  %v1853_v9 = vld [vmem:[%s1819_s11 + $0x8] ss:$0 sm:$0xff] }
  0xb6   : > { %v412_v15 = vmin.f32 %v410_v11, 1.0  ;;  %v409_v16 = vsub.f32 %v402_v13, %v1366_v3  ;;  %941 = vperm.xlu1 %1532, %v1757_v2  }
  0xb7   : > { %v321_v17 = vpop.permute.xlu0 %320  ;;  %v392_v4 = vmul.f32 %v390_v50, %v386_v18 }
  0xb8   : > { %v414_v19 = vmul.f32 0.5, %v412_v15  ;;  %v411_v20 = vand.u32 2147483647, %v409_v16  ;;  %v328_v21 = vsub.f32 %v321_v17, %v1823_v33  ;;  %v363_v33 = vsub.f32 %v357_v7, %v361_v23 }
  0xba   : > { %v416_v24 = vsub.f32 %v410_v11, %v414_v19  ;;  %v413_v25 = vmin.f32 %v411_v20, 1.0  ;;  %v330_v29 = vand.u32 2147483647, %v328_v21  ;;  %1533 = vset.pattern.permute.xlu1 %v1653_v27  ;;  %v425_v26 = vpop.permute.xlu1 %424  ;;  %v365_v56 = vmul.f32 %v363_v33, %v359_v14 }
  0xbb   : > { %v435_v35 = vsub.f32 %v425_v26, %v1367_v22  ;;  %964 = vperm.xlu1 %1533, %v1755_v1  }
  0xbc   : > { %v418_v37 = vmul.f32 %v416_v24, %v412_v15  ;;  %v332_v38 = vmin.f32 %v330_v29, 1.0  ;;  %v452_v39 = vpop.permute.xlu0 %451  ;;  %v415_v43 = vmul.f32 0.5, %v413_v25 }
  0xbd   : > { %v437_v40 = vand.u32 2147483647, %v435_v35  ;;  %v462_v41 = vsub.f32 %v452_v39, %v1368_v34 }
  0xbe   : > { %v420_v42 = vadd.f32 %v418_v37, %v393_v12  ;;  %v334_v44 = vmul.f32 0.5, %v332_v38  ;;  %v429_v45 = vpop.permute.xlu1 %428  ;;  %v417_v58 = vsub.f32 %v411_v20, %v415_v43 }
  0xbf   : > { %v439_v46 = vmin.f32 %v437_v40, 1.0  ;;  %v464_v47 = vand.u32 2147483647, %v462_v41  ;;  %v436_v27 = vsub.f32 %v429_v45, %v1367_v22  ;;  %1535 = vset.pattern.permute.xlu1 %v1661_v48  ;;  %v1370_v41 = vld [vmem:[%s1819_s11 + $0x7] ss:$0 sm:$0xff] }
  0xc0   : > { %v336_v51 = vsub.f32 %v330_v29, %v334_v44  ;;  %991 = vperm.xlu1 %1535, %v1755_v1   ;;  %v419_v13 = vmul.f32 %v417_v58, %v413_v25  ;;  %v1662_v58 = vmov 28  }
  0xc1   : > { %v441_v52 = vmul.f32 0.5, %v439_v46  ;;  %v466_v53 = vmin.f32 %v464_v47, 1.0  ;;  %v438_v54 = vand.u32 2147483647, %v436_v27  ;;  %v483_v55 = vpop.permute.xlu0 %482 }
  0xc2   : > { %v338_v59 = vmul.f32 %v336_v51, %v332_v38  ;;  %v490_v60 = vsub.f32 %v483_v55, %v1369_v49  ;;  %v1859_v38 = vld [vmem:[%s1819_s11 + $0x9] ss:$0 sm:$0xff] }
  0xc3   : > { %v443_v61 = vsub.f32 %v437_v40, %v441_v52  ;;  %v468_v62 = vmul.f32 0.5, %v466_v53  ;;  %v440_v63 = vmin.f32 %v438_v54, 1.0  ;;  %v456_v3 = vpop.permute.xlu1 %455 }
  0xc4   : > { %v367_v5 = vadd.f32 %v365_v56, %v338_v59  ;;  %v463_v7 = vsub.f32 %v456_v3, %v1368_v34  ;;  %995 = vperm.xlu1 %1535, %v1757_v2   ;;  %v492_v8 = vand.u32 2147483647, %v490_v60 }
  0xc5   : > { %v445_v10 = vmul.f32 %v443_v61, %v439_v46  ;;  %v470_v11 = vsub.f32 %v464_v47, %v468_v62  ;;  %v442_v12 = vmul.f32 0.5, %v440_v63 }
  0xc6   : > { %v394_v14 = vadd.f32 %v392_v4, %v367_v5  ;;  %v465_v15 = vand.u32 2147483647, %v463_v7  ;;  %v494_v16 = vmin.f32 %v492_v8, 1.0  ;;  %v533_v17 = vpop.permute.xlu0 %532 }
  0xc7   : > { %v447_v19 = vadd.f32 %v445_v10, %v420_v42  ;;  %v472_v20 = vmul.f32 %v470_v11, %v466_v53  ;;  %v444_v21 = vsub.f32 %v438_v54, %v442_v12  ;;  %v543_v18 = vsub.f32 %v533_v17, %v1853_v9 }
  0xc8   : > { %v421_v22 = vadd.f32 %v419_v13, %v394_v14  ;;  %v467_v23 = vmin.f32 %v465_v15, 1.0  ;;  %v496_v24 = vmul.f32 0.5, %v494_v16  ;;  %1537 = vset.pattern.permute.xlu1 %v1654_v28  ;;  %v479_v29 = vpop.permute.xlu1 %478 }
  0xc9   : > { %v474_v26 = vadd.f32 %v472_v20, %v447_v19  ;;  %v446_v34 = vmul.f32 %v444_v21, %v440_v63  ;;  %v489_v25 = vsub.f32 %v479_v29, %v1369_v49  ;;  %1022 = vperm.xlu1 %1537, %v1757_v2   ;;  %v545_v35 = vand.u32 2147483647, %v543_v18  ;;  %v1869_v63 = vld [vmem:[%s1819_s11 + $0xb] ss:$0 sm:$0xff] }
  0xca   : > { %v469_v36 = vmul.f32 0.5, %v467_v23  ;;  %v498_v37 = vsub.f32 %v492_v8, %v496_v24 }
  0xcb   : > { %v448_v39 = vadd.f32 %v446_v34, %v421_v22  ;;  %v491_v40 = vand.u32 2147483647, %v489_v25  ;;  %v564_v33 = vpop.permute.xlu0 %563  ;;  %v547_v43 = vmin.f32 %v545_v35, 1.0 }
  0xcc   : > { %v471_v42 = vsub.f32 %v465_v15, %v469_v36  ;;  %v571_v45 = vsub.f32 %v564_v33, %v1859_v38  ;;  %v500_v47 = vmul.f32 %v498_v37, %v494_v16 }
  0xcd   : > { %v493_v44 = vmin.f32 %v491_v40, 1.0  ;;  %1538 = vset.pattern.permute.xlu1 %v1656_v30  ;;  %v506_v28 = vpop.permute.xlu1 %505  ;;  %v549_v51 = vmul.f32 0.5, %v547_v43 }
  0xce   : > { %v473_v46 = vmul.f32 %v471_v42, %v467_v23  ;;  %v516_v27 = vsub.f32 %v506_v28, %v1370_v41  ;;  %1045 = vperm.xlu1 %1538, %v1755_v1   ;;  %v573_v54 = vand.u32 2147483647, %v571_v45  ;;  %v1549_v23 = vpop.eup %1548 }
  0xcf   : > { %v495_v48 = vmul.f32 0.5, %v493_v44  ;;  %v551_v61 = vsub.f32 %v545_v35, %v549_v51  ;;  %v1875_v35 = vld [vmem:[%s1819_s11 + $0xc] ss:$0 sm:$0xff] }
  0xd0   : > { %v475_v49 = vadd.f32 %v473_v46, %v448_v39  ;;  %v518_v50 = vand.u32 2147483647, %v516_v27  ;;  %v614_v3 = vpop.permute.xlu0 %613  ;;  %v575_v5 = vmin.f32 %v573_v54, 1.0 }
  0xd1   : > { %v497_v52 = vsub.f32 %v491_v40, %v495_v48  ;;  %v510_v53 = vpop.permute.xlu1 %509  ;;  %v624_v12 = vsub.f32 %v614_v3, %v1869_v63  ;;  %v553_v14 = vmul.f32 %v551_v61, %v547_v43  ;;  %v1373_v40 = vld [vmem:[%s1819_s11 + $0xa] ss:$0 sm:$0xff]  ;;  %v286_v48 = vand.u32 2147483648, %v1835_v57 }
  0xd2   : > { %v502_v55 = vadd.f32 %v500_v47, %v475_v49  ;;  %v520_v30 = vmin.f32 %v518_v50, 1.0  ;;  %v517_v56 = vsub.f32 %v510_v53, %v1370_v41  ;;  %1540 = vset.pattern.permute.xlu1 %v1662_v58  ;;  %v577_v17 = vmul.f32 0.5, %v575_v5 }
  0xd3   : > { %v499_v59 = vmul.f32 %v497_v52, %v493_v44  ;;  %1072 = vperm.xlu1 %1540, %v1755_v1   ;;  %v626_v22 = vand.u32 2147483647, %v624_v12  ;;  %v282_v41 = vmul.f32 %v1549_v23, %v1835_v57  ;;  %v293_v49 = vand.u32 2147483648, %v1840_v6 }
  0xd4   : > { %v522_v60 = vmul.f32 0.5, %v520_v30  ;;  %v519_v62 = vand.u32 2147483647, %v517_v56  ;;  %v579_v25 = vsub.f32 %v573_v54, %v577_v17 }
  0xd5   : > { %v501_v4 = vadd.f32 %v499_v59, %v474_v26  ;;  %v645_v36 = vpop.permute.xlu0 %644  ;;  %v628_v42 = vmin.f32 %v626_v22, 1.0  ;;  %v284_v53 = vsel %vm283_vm1, %v1835_v57, %v282_v41  ;;  %v1378_v41 = vld [vmem:[%s1819_s11 + $0xf] ss:$0 sm:$0xff] }
  0xd6   : > { %v524_v7 = vsub.f32 %v518_v50, %v522_v60  ;;  %v521_v8 = vmin.f32 %v519_v62, 1.0  ;;  %v537_v10 = vpop.permute.xlu1 %536  ;;  %v652_v45 = vsub.f32 %v645_v36, %v1875_v35  ;;  %v581_v46 = vmul.f32 %v579_v25, %v575_v5 }
  0xd7   : > { %v544_v11 = vsub.f32 %v537_v10, %v1853_v9  ;;  %v1551_v9 = vpop.eup %1550  ;;  %v630_v52 = vmul.f32 0.5, %v628_v42 }
  0xd8   : > { %v526_v13 = vmul.f32 %v524_v7, %v520_v30  ;;  %v523_v15 = vmul.f32 0.5, %v521_v8  ;;  %v289_v43 = vmul.f32 %v1551_v9, %v1840_v6  ;;  %v654_v30 = vand.u32 2147483647, %v652_v45  ;;  %v1892_v7 = vld [vmem:[%s1819_s11 + $0xe] ss:$0 sm:$0xff] }
  0xd9   : > { %v546_v16 = vand.u32 2147483647, %v544_v11 }
  0xda   : > { %v528_v19 = vadd.f32 %v526_v13, %v501_v4  ;;  %v525_v20 = vsub.f32 %v519_v62, %v523_v15  ;;  %v291_v56 = vsel %vm290_vm2, %v1840_v6, %v289_v43  ;;  %v287_v62 = vsel %vm285_vm3, %v286_v48, %v284_v53 }
  0xdb   : > { %v548_v21 = vmin.f32 %v546_v16, 1.0  ;;  %v560_v18 = vpop.permute.xlu1 %559  ;;  %v632_v4 = vsub.f32 %v626_v22, %v630_v52  ;;  %v294_v10 = vsel %vm292_vm4, %v293_v49, %v291_v56  ;;  %v656_v12 = vmin.f32 %v654_v30, 1.0 }
  0xdc   : > { %v555_v24 = vadd.f32 %v553_v14, %v528_v19  ;;  %v527_v29 = vmul.f32 %v525_v20, %v521_v8  ;;  %v570_v26 = vsub.f32 %v560_v18, %v1859_v38  ;;  %v695_v8 = vpop.permute.xlu0 %694  ;;  %v1361_v17 = vadd.f32 -10.0, %v287_v62 }
  0xdd   : > { %v550_v34 = vmul.f32 0.5, %v548_v21  ;;  %v1362_v19 = vadd.f32 -10.0, %v294_v10  ;;  %v634_v20 = vmul.f32 %v632_v4, %v628_v42  ;;  %v658_v22 = vmul.f32 0.5, %v656_v12 }
  0xde   : > { %v529_v37 = vadd.f32 %v527_v29, %v502_v55  ;;  %v572_v39 = vand.u32 2147483647, %v570_v26 }
  0xdf   : > { %v552_v33 = vsub.f32 %v546_v16, %v550_v34  ;;  %v705_v16 = vsub.f32 %v695_v8, %v1892_v7  ;;  %v297_v34 = vmul.f32 %v1361_v17, %v1361_v17  ;;  %v298_v25 = vmul.f32 %v1362_v19, %v1362_v19  ;;  %v1900_v8 = vld [vmem:[%s1819_s11 + $0x11] ss:$0 sm:$0xff] }
  0xe0   : > { %v574_v44 = vmin.f32 %v572_v39, 1.0  ;;  %v587_v28 = vpop.permute.xlu1 %586 }
  0xe1   : > { %v554_v38 = vmul.f32 %v552_v33, %v548_v21  ;;  %v597_v47 = vsub.f32 %v587_v28, %v1373_v40  ;;  %v707_v9 = vand.u32 2147483647, %v705_v16  ;;  %v726_v33 = vpop.permute.xlu0 %725 }
  0xe2   : > { %v576_v27 = vmul.f32 0.5, %v574_v44  ;;  %v733_v48 = vsub.f32 %v726_v33, %v1378_v41 }
  0xe3   : > { %v556_v50 = vadd.f32 %v554_v38, %v529_v37  ;;  %v599_v51 = vand.u32 2147483647, %v597_v47  ;;  %v709_v45 = vmin.f32 %v707_v9, 1.0  ;;  %v300_v38 = vsel %vm299_vm5, %v297_v34, 0.0 }
  0xe4   : > { %v578_v54 = vsub.f32 %v572_v39, %v576_v27  ;;  %v591_v55 = vpop.permute.xlu1 %590 }
  0xe5   : > { %v583_v58 = vadd.f32 %v581_v46, %v556_v50  ;;  %v601_v59 = vmin.f32 %v599_v51, 1.0  ;;  %v598_v60 = vsub.f32 %v591_v55, %v1373_v40  ;;  %v660_v40 = vsub.f32 %v654_v30, %v658_v22  ;;  %v776_v10 = vpop.permute.xlu0 %775 }
  0xe6   : > { %v580_v61 = vmul.f32 %v578_v54, %v574_v44  ;;  %v1376_v44 = vld [vmem:[%s1819_s11 + $0xd] ss:$0 sm:$0xff]  ;;  %v301_v46 = vsel %vm299_vm5, %v298_v25, 0.0  ;;  %v711_v55 = vmul.f32 0.5, %v709_v45  ;;  %v786_v16 = vsub.f32 %v776_v10, %v1900_v8 }
  0xe7   : > { %v603_v3 = vmul.f32 0.5, %v601_v59  ;;  %v600_v5 = vand.u32 2147483647, %v598_v60  ;;  %v662_v50 = vmul.f32 %v660_v40, %v656_v12  ;;  %v1379_v40 = vld [vmem:[%s1819_s11 + $0x10] ss:$0 sm:$0xff] }
  0xe8   : > { %v582_v11 = vadd.f32 %v580_v61, %v555_v24  ;;  %v713_v4 = vsub.f32 %v707_v9, %v711_v55 }
  0xe9   : > { %v605_v13 = vsub.f32 %v599_v51, %v603_v3  ;;  %v602_v14 = vmin.f32 %v600_v5, 1.0  ;;  %v618_v15 = vpop.permute.xlu1 %617 }
  0xea   : > { %v625_v6 = vsub.f32 %v618_v15, %v1869_v63  ;;  %v715_v19 = vmul.f32 %v713_v4, %v709_v45 }
  0xeb   : > { %v607_v57 = vmul.f32 %v605_v13, %v601_v59  ;;  %v604_v21 = vmul.f32 0.5, %v602_v14 }
  0xec   : > { %v627_v18 = vand.u32 2147483647, %v625_v6 }
  0xed   : > { %v609_v23 = vadd.f32 %v607_v57, %v582_v11  ;;  %v606_v29 = vsub.f32 %v600_v5, %v604_v21 }
  0xee   : > { %v629_v24 = vmin.f32 %v627_v18, 1.0  ;;  %v641_v26 = vpop.permute.xlu1 %640 }
  0xef   : > { %v636_v36 = vadd.f32 %v634_v20, %v609_v23  ;;  %v608_v63 = vmul.f32 %v606_v29, %v602_v14  ;;  %v651_v37 = vsub.f32 %v641_v26, %v1875_v35  ;;  %v302_v35 = vadd.f32 %v301_v46, %v300_v38 }
  0xf0   : > { %v631_v39 = vmul.f32 0.5, %v629_v24 }
  0xf1   : > { %v610_v42 = vadd.f32 %v608_v63, %v583_v58  ;;  %v653_v43 = vand.u32 2147483647, %v651_v37  ;;  %v735_v58 = vand.u32 2147483647, %v733_v48  ;;  %v807_v63 = vpop.permute.xlu0 %806 }
  0xf2   : > { %v633_v28 = vsub.f32 %v627_v18, %v631_v39 }
  0xf3   : > { %v655_v47 = vmin.f32 %v653_v43, 1.0  ;;  %v668_v27 = vpop.permute.xlu1 %667  ;;  %v737_v12 = vmin.f32 %v735_v58, 1.0 }
  0xf4   : > { %v635_v49 = vmul.f32 %v633_v28, %v629_v24  ;;  %v678_v51 = vsub.f32 %v668_v27, %v1376_v44  ;;  %v788_v24 = vand.u32 2147483647, %v786_v16 }
  0xf5   : > { %v657_v52 = vmul.f32 0.5, %v655_v47  ;;  %v739_v21 = vmul.f32 0.5, %v737_v12 }
  0xf6   : > { %v637_v53 = vadd.f32 %v635_v49, %v610_v42  ;;  %v680_v54 = vand.u32 2147483647, %v678_v51  ;;  %v790_v42 = vmin.f32 %v788_v24, 1.0 }
  0xf7   : > { %v659_v30 = vsub.f32 %v653_v43, %v657_v52  ;;  %v672_v56 = vpop.permute.xlu1 %671  ;;  %303 = vadd.xlane.f32.xlu1 %v302_v35 }
  0xf8   : > { %v664_v59 = vadd.f32 %v662_v50, %v637_v53  ;;  %v682_v60 = vmin.f32 %v680_v54, 1.0  ;;  %v679_v61 = vsub.f32 %v672_v56, %v1376_v44  ;;  %v792_v48 = vmul.f32 0.5, %v790_v42 }
  0xf9   : > { %v661_v62 = vmul.f32 %v659_v30, %v655_v47 }
  0xfa   : > { %v684_v3 = vmul.f32 0.5, %v682_v60  ;;  %v681_v5 = vand.u32 2147483647, %v679_v61  ;;  %v794_v30 = vsub.f32 %v788_v24, %v792_v48 }
  0xfb   : > { %v663_v11 = vadd.f32 %v661_v62, %v636_v36  ;;  %v741_v36 = vsub.f32 %v735_v58, %v739_v21  ;;  %v1910_v58 = vld [vmem:[%s1819_s11 + $0x14] ss:$0 sm:$0xff] }
  0xfc   : > { %v686_v13 = vsub.f32 %v680_v54, %v684_v3  ;;  %v683_v14 = vmin.f32 %v681_v5, 1.0  ;;  %v699_v15 = vpop.permute.xlu1 %698 }
  0xfd   : > { %v706_v6 = vsub.f32 %v699_v15, %v1892_v7  ;;  %v1381_v7 = vld [vmem:[%s1819_s11 + $0x12] ss:$0 sm:$0xff]  ;;  %v743_v38 = vmul.f32 %v741_v36, %v737_v12  ;;  %v796_v12 = vmul.f32 %v794_v30, %v790_v42 }
  0xfe   : > { %v688_v17 = vmul.f32 %v686_v13, %v682_v60  ;;  %v685_v57 = vmul.f32 0.5, %v683_v14  ;;  %v814_v28 = vsub.f32 %v807_v63, %v1381_v7 }
  0xff   : > { %v708_v20 = vand.u32 2147483647, %v706_v6 }
 0x100   : > { %v690_v18 = vadd.f32 %v688_v17, %v663_v11  ;;  %v687_v22 = vsub.f32 %v681_v5, %v685_v57  ;;  %v816_v51 = vand.u32 2147483647, %v814_v28 }
 0x101   : > { %v710_v23 = vmin.f32 %v708_v20, 1.0  ;;  %v722_v29 = vpop.permute.xlu1 %721 }
 0x102   : > { %v717_v26 = vadd.f32 %v715_v19, %v690_v18  ;;  %v689_v9 = vmul.f32 %v687_v22, %v683_v14  ;;  %v732_v34 = vsub.f32 %v722_v29, %v1378_v41  ;;  %v818_v61 = vmin.f32 %v816_v51, 1.0 }
 0x103   : > { %v712_v25 = vmul.f32 0.5, %v710_v23  ;;  %v1663_v22 = vmov 31  }
 0x104   : > { %v691_v37 = vadd.f32 %v689_v9, %v664_v59  ;;  %v734_v39 = vand.u32 2147483647, %v732_v34  ;;  %v857_v59 = vpop.permute.xlu0 %856  ;;  %v820_v14 = vmul.f32 0.5, %v818_v61 }
 0x105   : > { %v714_v33 = vsub.f32 %v708_v20, %v712_v25  ;;  %v867_v10 = vsub.f32 %v857_v59, %v1910_v58 }
 0x106   : > { %v736_v43 = vmin.f32 %v734_v39, 1.0  ;;  %v749_v44 = vpop.permute.xlu1 %748  ;;  %v822_v18 = vsub.f32 %v816_v51, %v820_v14 }
 0x107   : > { %v716_v45 = vmul.f32 %v714_v33, %v710_v23  ;;  %v759_v46 = vsub.f32 %v749_v44, %v1379_v40  ;;  %v869_v19 = vand.u32 2147483647, %v867_v10  ;;  %v1384_v23 = vld [vmem:[%s1819_s11 + $0x15] ss:$0 sm:$0xff] }
 0x108   : > { %v738_v47 = vmul.f32 0.5, %v736_v43  ;;  %1076 = vperm.xlu1 %1540, %v1757_v2  }
 0x109   : > { %v718_v41 = vadd.f32 %v716_v45, %v691_v37  ;;  %v761_v27 = vand.u32 2147483647, %v759_v46  ;;  %v871_v34 = vmin.f32 %v869_v19, 1.0 }
 0x10a   : > { %v740_v49 = vsub.f32 %v734_v39, %v738_v47  ;;  %v753_v50 = vpop.permute.xlu1 %752  ;;  %v824_v39 = vmul.f32 %v822_v18, %v818_v61 }
 0x10b   : > { %v745_v52 = vadd.f32 %v743_v38, %v718_v41  ;;  %v763_v35 = vmin.f32 %v761_v27, 1.0  ;;  %v760_v53 = vsub.f32 %v753_v50, %v1379_v40 }
 0x10c   : > { %v742_v54 = vmul.f32 %v740_v49, %v736_v43  ;;  %1542 = vset.pattern.permute.xlu1 %v1657_v31  ;;  %v873_v43 = vmul.f32 0.5, %v871_v34  ;;  %v1925_v49 = vld [vmem:[%s1819_s11 + $0x17] ss:$0 sm:$0xff] }
 0x10d   : > { %v765_v55 = vmul.f32 0.5, %v763_v35  ;;  %v762_v56 = vand.u32 2147483647, %v760_v53  ;;  %1103 = vperm.xlu1 %1542, %v1757_v2  }
 0x10e   : > { %v744_v60 = vadd.f32 %v742_v54, %v717_v26  ;;  %v1382_v26 = vld [vmem:[%s1819_s11 + $0x13] ss:$0 sm:$0xff]  ;;  %v875_v48 = vsub.f32 %v869_v19, %v873_v43 }
 0x10f   : > { %v767_v62 = vsub.f32 %v761_v27, %v765_v55  ;;  %v764_v3 = vmin.f32 %v762_v56, 1.0  ;;  %v780_v4 = vpop.permute.xlu1 %779 }
 0x110   : > { %v787_v5 = vsub.f32 %v780_v4, %v1900_v8  ;;  %v877_v59 = vmul.f32 %v875_v48, %v871_v34 }
 0x111   : > { %v769_v11 = vmul.f32 %v767_v62, %v763_v35  ;;  %v766_v31 = vmul.f32 0.5, %v764_v3  ;;  %1543 = vset.pattern.permute.xlu1 %v1658_v32  ;;  %v888_v32 = vpop.permute.xlu0 %887 }
 0x112   : > { %v789_v13 = vand.u32 2147483647, %v787_v5  ;;  %1126 = vperm.xlu1 %1543, %v1755_v1   ;;  %v895_v63 = vsub.f32 %v888_v32, %v1384_v23 }
 0x113   : > { %v771_v15 = vadd.f32 %v769_v11, %v744_v60  ;;  %v768_v6 = vsub.f32 %v762_v56, %v766_v31 }
 0x114   : > { %v791_v16 = vmin.f32 %v789_v13, 1.0  ;;  %v803_v17 = vpop.permute.xlu1 %802  ;;  %v897_v45 = vand.u32 2147483647, %v895_v63 }
 0x115   : > { %v798_v57 = vadd.f32 %v796_v12, %v771_v15  ;;  %v770_v8 = vmul.f32 %v768_v6, %v764_v3  ;;  %v813_v20 = vsub.f32 %v803_v17, %v1381_v7  ;;  %v938_v50 = vpop.permute.xlu0 %937  ;;  %v1385_v17 = vld [vmem:[%s1819_s11 + $0x16] ss:$0 sm:$0xff] }
 0x116   : > { %v793_v21 = vmul.f32 0.5, %v791_v16  ;;  %1545 = vset.pattern.permute.xlu1 %v1663_v22  ;;  %v948_v30 = vsub.f32 %v938_v50, %v1925_v49 }
 0x117   : > { %v772_v29 = vadd.f32 %v770_v8, %v745_v52  ;;  %v815_v24 = vand.u32 2147483647, %v813_v20  ;;  %1153 = vperm.xlu1 %1545, %v1755_v1   ;;  %v271_v1 = vld [vmem:[%s2004_s2 + $0x8] sm:$0xff]  ;;  %v899_v52 = vmin.f32 %v897_v45, 1.0 }
 0x118   : > { %v795_v9 = vsub.f32 %v789_v13, %v793_v21  ;;  %v950_v10 = vand.u32 2147483647, %v948_v30 }
 0x119   : > { %v817_v25 = vmin.f32 %v815_v24, 1.0  ;;  %v830_v36 = vpop.permute.xlu1 %829  ;;  %v901_v61 = vmul.f32 0.5, %v899_v52  ;;  %v969_v15 = vpop.permute.xlu0 %968 }
 0x11a   : > { %v797_v37 = vmul.f32 %v795_v9, %v791_v16  ;;  %v840_v40 = vsub.f32 %v830_v36, %v1382_v26 }
 0x11b   : > { %v819_v7 = vmul.f32 0.5, %v817_v25  ;;  %1157 = vperm.xlu1 %1545, %v1757_v2   ;;  %v903_v14 = vsub.f32 %v897_v45, %v901_v61 }
 0x11c   : > { %v799_v33 = vadd.f32 %v797_v37, %v772_v29  ;;  %v842_v42 = vand.u32 2147483647, %v840_v40 }
 0x11d   : > { %v821_v44 = vsub.f32 %v815_v24, %v819_v7  ;;  %v834_v28 = vpop.permute.xlu1 %833  ;;  %v905_v22 = vmul.f32 %v903_v14, %v899_v52  ;;  %v1019_v43 = vpop.permute.xlu0 %1018 }
 0x11e   : > { %v826_v38 = vadd.f32 %v824_v39, %v799_v33  ;;  %v844_v46 = vmin.f32 %v842_v42, 1.0  ;;  %v841_v47 = vsub.f32 %v834_v28, %v1382_v26 }
 0x11f   : > { %v823_v41 = vmul.f32 %v821_v44, %v817_v25  ;;  %1547 = vset.pattern.permute.xlu1 %v1632_v0 }
 0x120   : > { %v846_v27 = vmul.f32 0.5, %v844_v46  ;;  %v843_v2 = vand.u32 2147483647, %v841_v47  ;;  %1183 = vperm.xlu1 %1547, %v271_v1  }
 0x121   : > { %v825_v51 = vadd.f32 %v823_v41, %v798_v57  ;;  %v952_v57 = vmin.f32 %v950_v10, 1.0 }
 0x122   : > { %v848_v35 = vsub.f32 %v842_v42, %v846_v27  ;;  %v845_v53 = vmin.f32 %v843_v2, 1.0  ;;  %v861_v54 = vpop.permute.xlu1 %860  ;;  %v1932_v42 = vld [vmem:[%s1819_s11 + $0x1a] ss:$0 sm:$0xff] }
 0x123   : > { %v868_v55 = vsub.f32 %v861_v54, %v1910_v58  ;;  %v1387_v58 = vld [vmem:[%s1819_s11 + $0x18] ss:$0 sm:$0xff]  ;;  %v1029_v47 = vsub.f32 %v1019_v43, %v1932_v42 }
 0x124   : > { %v850_v56 = vmul.f32 %v848_v35, %v844_v46  ;;  %v847_v0 = vmul.f32 0.5, %v845_v53  ;;  %v976_v21 = vsub.f32 %v969_v15, %v1387_v58 }
 0x125   : > { %v870_v60 = vand.u32 2147483647, %v868_v55  ;;  %v1031_v54 = vand.u32 2147483647, %v1029_v47 }
 0x126   : > { %v852_v62 = vadd.f32 %v850_v56, %v825_v51  ;;  %v849_v3 = vsub.f32 %v843_v2, %v847_v0  ;;  %v978_v25 = vand.u32 2147483647, %v976_v21 }
 0x127   : > { %v872_v4 = vmin.f32 %v870_v60, 1.0  ;;  %v884_v5 = vpop.permute.xlu1 %883 }
 0x128   : > { %v879_v11 = vadd.f32 %v877_v59, %v852_v62  ;;  %v851_v12 = vmul.f32 %v849_v3, %v845_v53  ;;  %v894_v31 = vsub.f32 %v884_v5, %v1384_v23  ;;  %v954_v23 = vmul.f32 0.5, %v952_v57  ;;  %v1388_v3 = vld [vmem:[%s1819_s11 + $0x19] ss:$0 sm:$0xff] }
 0x129   : > { %v874_v13 = vmul.f32 0.5, %v872_v4  ;;  %v980_v28 = vmin.f32 %v978_v25, 1.0  ;;  %v1033_v5 = vmin.f32 %v1031_v54, 1.0 }
 0x12a   : > { %v853_v6 = vadd.f32 %v851_v12, %v826_v38  ;;  %v896_v16 = vand.u32 2147483647, %v894_v31  ;;  %v956_v7 = vsub.f32 %v950_v10, %v954_v23 }
 0x12b   : > { %v876_v19 = vsub.f32 %v870_v60, %v874_v13  ;;  %v982_v50 = vmul.f32 0.5, %v980_v28  ;;  %v1050_v60 = vpop.permute.xlu0 %1049 }
 0x12c   : > { %v898_v8 = vmin.f32 %v896_v16, 1.0  ;;  %v911_v20 = vpop.permute.xlu1 %910  ;;  %v958_v27 = vmul.f32 %v956_v7, %v952_v57 }
 0x12d   : > { %v878_v18 = vmul.f32 %v876_v19, %v872_v4  ;;  %v921_v32 = vsub.f32 %v911_v20, %v1385_v17  ;;  %v984_v0 = vsub.f32 %v978_v25, %v982_v50  ;;  %v1391_v50 = vld [vmem:[%s1819_s11 + $0x1c] ss:$0 sm:$0xff] }
 0x12e   : > { %v900_v29 = vmul.f32 0.5, %v898_v8 }
 0x12f   : > { %v880_v24 = vadd.f32 %v878_v18, %v853_v6  ;;  %v923_v26 = vand.u32 2147483647, %v921_v32  ;;  %v986_v13 = vmul.f32 %v984_v0, %v980_v28 }
 0x130   : > { %v902_v9 = vsub.f32 %v896_v16, %v900_v29  ;;  %v915_v34 = vpop.permute.xlu1 %914 }
 0x131   : > { %v907_v36 = vadd.f32 %v905_v22, %v880_v24  ;;  %v925_v63 = vmin.f32 %v923_v26, 1.0  ;;  %v922_v37 = vsub.f32 %v915_v34, %v1385_v17  ;;  %v1939_v24 = vld [vmem:[%s1819_s11 + $0x1d] ss:$0 sm:$0xff] }
 0x132   : > { %v904_v39 = vmul.f32 %v902_v9, %v898_v8 }
 0x133   : > { %v927_v40 = vmul.f32 0.5, %v925_v63  ;;  %v924_v33 = vand.u32 2147483647, %v922_v37 }
 0x134   : > { %v906_v44 = vadd.f32 %v904_v39, %v879_v11 }
 0x135   : > { %v929_v45 = vsub.f32 %v923_v26, %v927_v40  ;;  %v926_v1 = vmin.f32 %v924_v33, 1.0  ;;  %v942_v38 = vpop.permute.xlu1 %941  ;;  %v1100_v26 = vpop.permute.xlu0 %1099 }
 0x136   : > { %v949_v46 = vsub.f32 %v942_v38, %v1925_v49  ;;  %v1390_v49 = vld [vmem:[%s1819_s11 + $0x1b] ss:$0 sm:$0xff]  ;;  %v1110_v37 = vsub.f32 %v1100_v26, %v1939_v24 }
 0x137   : > { %v931_v41 = vmul.f32 %v929_v45, %v925_v63  ;;  %v928_v48 = vmul.f32 0.5, %v926_v1  ;;  %v1057_v12 = vsub.f32 %v1050_v60, %v1390_v49 }
 0x138   : > { %v951_v2 = vand.u32 2147483647, %v949_v46  ;;  %v1112_v38 = vand.u32 2147483647, %v1110_v37 }
 0x139   : > { %v933_v51 = vadd.f32 %v931_v41, %v906_v44  ;;  %v930_v52 = vsub.f32 %v924_v33, %v928_v48  ;;  %v1059_v57 = vand.u32 2147483647, %v1057_v12 }
 0x13a   : > { %v953_v35 = vmin.f32 %v951_v2, 1.0  ;;  %v965_v53 = vpop.permute.xlu1 %964 }
 0x13b   : > { %v960_v55 = vadd.f32 %v958_v27, %v933_v51  ;;  %v932_v30 = vmul.f32 %v930_v52, %v926_v1  ;;  %v975_v56 = vsub.f32 %v965_v53, %v1387_v58  ;;  %v1035_v58 = vmul.f32 0.5, %v1033_v5 }
 0x13c   : > { %v955_v59 = vmul.f32 0.5, %v953_v35  ;;  %v1061_v9 = vmin.f32 %v1059_v57, 1.0  ;;  %v1114_v52 = vmin.f32 %v1112_v38, 1.0 }
 0x13d   : > { %v934_v61 = vadd.f32 %v932_v30, %v907_v36  ;;  %v977_v62 = vand.u32 2147483647, %v975_v56  ;;  %v1037_v32 = vsub.f32 %v1031_v54, %v1035_v58 }
 0x13e   : > { %v957_v4 = vsub.f32 %v951_v2, %v955_v59  ;;  %v1063_v43 = vmul.f32 0.5, %v1061_v9  ;;  %v1116_v60 = vmul.f32 0.5, %v1114_v52 }
 0x13f   : > { %v979_v10 = vmin.f32 %v977_v62, 1.0  ;;  %v992_v11 = vpop.permute.xlu1 %991  ;;  %v1039_v40 = vmul.f32 %v1037_v32, %v1033_v5 }
 0x140   : > { %v959_v31 = vmul.f32 %v957_v4, %v953_v35  ;;  %v1002_v14 = vsub.f32 %v992_v11, %v1388_v3  ;;  %v1065_v48 = vsub.f32 %v1059_v57, %v1063_v43  ;;  %v1118_v5 = vsub.f32 %v1112_v38, %v1116_v60 }
 0x141   : > { %v981_v15 = vmul.f32 0.5, %v979_v10 }
 0x142   : > { %v961_v6 = vadd.f32 %v959_v31, %v934_v61  ;;  %v1004_v16 = vand.u32 2147483647, %v1002_v14  ;;  %v1120_v31 = vmul.f32 %v1118_v5, %v1114_v52 }
 0x143   : > { %v983_v17 = vsub.f32 %v977_v62, %v981_v15  ;;  %v996_v19 = vpop.permute.xlu1 %995  ;;  %v1393_v15 = vld [vmem:[%s1819_s11 + $0x1e] ss:$0 sm:$0xff] }
 0x144   : > { %v988_v8 = vadd.f32 %v986_v13, %v961_v6  ;;  %v1006_v20 = vmin.f32 %v1004_v16, 1.0  ;;  %v1003_v21 = vsub.f32 %v996_v19, %v1388_v3  ;;  %v1131_v6 = vpop.permute.xlu0 %1130 }
 0x145   : > { %v985_v18 = vmul.f32 %v983_v17, %v979_v10 }
 0x146   : > { %v1008_v22 = vmul.f32 0.5, %v1006_v20  ;;  %v1005_v29 = vand.u32 2147483647, %v1003_v21 }
 0x147   : > { %v987_v23 = vadd.f32 %v985_v18, %v960_v55  ;;  %v1067_v55 = vmul.f32 %v1065_v48, %v1061_v9 }
 0x148   : > { %v1010_v34 = vsub.f32 %v1004_v16, %v1008_v22  ;;  %v1007_v25 = vmin.f32 %v1005_v29, 1.0  ;;  %v1023_v36 = vpop.permute.xlu1 %1022  ;;  %v1138_v16 = vsub.f32 %v1131_v6, %v1393_v15 }
 0x149   : > { %v1030_v63 = vsub.f32 %v1023_v36, %v1932_v42 }
 0x14a   : > { %v1012_v39 = vmul.f32 %v1010_v34, %v1006_v20  ;;  %v1009_v7 = vmul.f32 0.5, %v1007_v25  ;;  %v1140_v57 = vand.u32 2147483647, %v1138_v16 }
 0x14b   : > { %v1032_v33 = vand.u32 2147483647, %v1030_v63 }
 0x14c   : > { %v1014_v44 = vadd.f32 %v1012_v39, %v987_v23  ;;  %v1011_v28 = vsub.f32 %v1005_v29, %v1009_v7  ;;  %v1142_v22 = vmin.f32 %v1140_v57, 1.0 }
 0x14d   : > { %v1034_v45 = vmin.f32 %v1032_v33, 1.0  ;;  %v1046_v1 = vpop.permute.xlu1 %1045 }
 0x14e   : > { %v1041_v46 = vadd.f32 %v1039_v40, %v1014_v44  ;;  %v1013_v47 = vmul.f32 %v1011_v28, %v1007_v25  ;;  %v1056_v41 = vsub.f32 %v1046_v1, %v1390_v49  ;;  %v1144_v36 = vmul.f32 0.5, %v1142_v22 }
 0x14f   : > { %v1036_v27 = vmul.f32 0.5, %v1034_v45 }
 0x150   : > { %v1015_v2 = vadd.f32 %v1013_v47, %v988_v8  ;;  %v1058_v42 = vand.u32 2147483647, %v1056_v41  ;;  %v1146_v44 = vsub.f32 %v1140_v57, %v1144_v36 }
 0x151   : > { %v1038_v51 = vsub.f32 %v1032_v33, %v1036_v27 }
 0x152   : > { %v1060_v35 = vmin.f32 %v1058_v42, 1.0  ;;  %v1073_v53 = vpop.permute.xlu1 %1072  ;;  %v1148_v41 = vmul.f32 %v1146_v44, %v1142_v22 }
 0x153   : > { %v1040_v54 = vmul.f32 %v1038_v51, %v1034_v45  ;;  %v1083_v30 = vsub.f32 %v1073_v53, %v1391_v50  ;;  %v1394_v45 = vld [vmem:[%s1819_s11 + $0x1f] ss:$0 sm:$0xff] }
 0x154   : > { %v1062_v56 = vmul.f32 0.5, %v1060_v35 }
 0x155   : > { %v1042_v59 = vadd.f32 %v1040_v54, %v1015_v2  ;;  %v1085_v0 = vand.u32 2147483647, %v1083_v30 }
 0x156   : > { %v1064_v61 = vsub.f32 %v1058_v42, %v1062_v56 }
 0x157   : > { %v1069_v62 = vadd.f32 %v1067_v55, %v1042_v59  ;;  %v1087_v49 = vmin.f32 %v1085_v0, 1.0 }
 0x158   : > { %v1066_v3 = vmul.f32 %v1064_v61, %v1060_v35 }
 0x159   : > { %v1089_v4 = vmul.f32 0.5, %v1087_v49 }
 0x15a   : > { %v1068_v10 = vadd.f32 %v1066_v3, %v1041_v46 }
 0x15b   : > { %v1091_v11 = vsub.f32 %v1085_v0, %v1089_v4 }
 0x15d   : > { %v1093_v12 = vmul.f32 %v1091_v11, %v1087_v49  ;;  %v1181_v49 = vpop.permute.xlu0 %1180 }
 0x15f   : > { %v1095_v13 = vadd.f32 %v1093_v12, %v1068_v10 }
 0x161   : > { %v1122_v14 = vadd.f32 %v1120_v31, %v1095_v13 }
 0x184   : > { %v304_v58 = vpop.xlane.xlu1 %303 }
 0x185   : > { %v305_v17 = vrot.slane %v304_v58, 4 }
 0x187   : > { %v306_v19 = vadd.f32 %v305_v17, %v304_v58 }
 0x188   : > { %v1077_v8 = vpop.permute.xlu1 %1076 }
 0x189   : > { %v307_v20 = vrot.slane %v306_v19, 2  ;;  %v1084_v21 = vsub.f32 %v1077_v8, %v1391_v50 }
 0x18b   : > { %v1086_v18 = vand.u32 2147483647, %v1084_v21  ;;  %v308_v32 = vadd.f32 %v307_v20, %v306_v19 }
 0x18c   : > { %v1104_v29 = vpop.permute.xlu1 %1103 }
 0x18d   : > { %v1088_v26 = vmin.f32 %v1086_v18, 1.0  ;;  %v1111_v23 = vsub.f32 %v1104_v29, %v1939_v24  ;;  %v309_v9 = vrot.slane %v308_v32, 1 }
 0x18f   : > { %v1090_v34 = vmul.f32 0.5, %v1088_v26  ;;  %v1113_v25 = vand.u32 2147483647, %v1111_v23  ;;  %v310_v63 = vadd.f32 %v309_v9, %v308_v32 }
 0x191   : > { %v1092_v37 = vsub.f32 %v1086_v18, %v1090_v34  ;;  %v1115_v39 = vmin.f32 %v1113_v25, 1.0  ;;  %1402 = vpush %v310_v63  ;;  %v1127_v40 = vpop.permute.xlu1 %1126 }
 0x192   : > { %v1137_v7 = vsub.f32 %v1127_v40, %v1393_v15 }
 0x193   : > { %v1094_v33 = vmul.f32 %v1092_v37, %v1088_v26  ;;  %v1117_v43 = vmul.f32 0.5, %v1115_v39 }
 0x194   : > { %v1139_v28 = vand.u32 2147483647, %v1137_v7 }
 0x195   : > { %v1096_v1 = vadd.f32 %v1094_v33, %v1069_v62  ;;  %v1119_v38 = vsub.f32 %v1113_v25, %v1117_v43  ;;  %v1395_v62 = vld [vmem:[%s2005_s3] ss:$0 sm:$0xff]  ;;  %v1220_v25 = vlaneseq }
 0x196   : > { %v1141_v46 = vmin.f32 %v1139_v28, 1.0  ;;  %v1154_v47 = vpop.permute.xlu1 %1153  ;;  %vm1189_vm6 = vcmp.eq.s32.totalorder %v1181_v49, %v1395_v62 }
 0x197   : > { %v1121_v24 = vmul.f32 %v1119_v38, %v1115_v39  ;;  %v1164_v27 = vsub.f32 %v1154_v47, %v1394_v45  ;;  %v1221_v36 = vshrl.u32 %v1220_v25, 7 }
 0x198   : > { %v1143_v48 = vmul.f32 0.5, %v1141_v46 }
 0x199   : > { %v1123_v2 = vadd.f32 %v1121_v24, %v1096_v1  ;;  %v1166_v42 = vand.u32 2147483647, %v1164_v27  ;;  %vm1226_vm9 = vcmp.eq.s32.totalorder %v1221_v36, 2  ;;  %vm1224_vm10 = vcmp.eq.s32.totalorder %v1221_v36, 1 }
 0x19a   : > { %v1145_v50 = vsub.f32 %v1139_v28, %v1143_v48  ;;  %v1158_v51 = vpop.permute.xlu1 %1157  ;;  %vm1222_vm11 = vcmp.eq.s32.totalorder %v1221_v36, 0 }
 0x19b   : > { %v1168_v52 = vmin.f32 %v1166_v42, 1.0  ;;  %v1165_v35 = vsub.f32 %v1158_v51, %v1394_v45  ;;  %v1150_v53 = vadd.f32 %v1148_v41, %v1123_v2 }
 0x19c   : > { %v1147_v54 = vmul.f32 %v1145_v50, %v1141_v46 }
 0x19d   : > { %v1170_v55 = vmul.f32 0.5, %v1168_v52  ;;  %v1167_v30 = vand.u32 2147483647, %v1165_v35 }
 0x19e   : > { %v1149_v56 = vadd.f32 %v1147_v54, %v1122_v14 }
 0x19f   : > { %v1172_v59 = vsub.f32 %v1166_v42, %v1170_v55  ;;  %v1169_v0 = vmin.f32 %v1167_v30, 1.0  ;;  %v1184_v5 = vpop.permute.xlu1 %1183 }
 0x1a0   : > { %vm1190_vm7 = vcmp.eq.s32.totalorder %v1184_v5, %v1395_v62 }
 0x1a1   : > { %v1174_v60 = vmul.f32 %v1172_v59, %v1168_v52  ;;  %v1171_v61 = vmul.f32 0.5, %v1169_v0 }
 0x1a3   : > { %v1173_v3 = vsub.f32 %v1167_v30, %v1171_v61  ;;  %v1176_v4 = vadd.f32 %v1174_v60, %v1149_v56 }
 0x1a5   : > { %v1175_v10 = vmul.f32 %v1173_v3, %v1169_v0  ;;  %v1205_v11 = vsel %vm1189_vm6, %v1176_v4, 0.0  ;;  %v1192_v13 = vsel %vm1191_vm8, %v1176_v4, 0.0 }
 0x1a6   : > { %v1207_v6 = vsel %vm1191_vm8, %v1205_v11, 0.0 }
 0x1a7   : > { %v1177_v12 = vadd.f32 %v1175_v10, %v1150_v53 }
 0x1a9   : > { %v1206_v31 = vsel %vm1190_vm7, %v1177_v12, 0.0  ;;  %v1193_v14 = vsel %vm1191_vm8, %v1177_v12, 0.0 }
 0x1aa   : > { %v1194_v15 = vadd.f32 %v1193_v14, %v1192_v13  ;;  %v1208_v16 = vsel %vm1191_vm8, %v1206_v31, 0.0 }
 0x1ab   : > { %v1209_v58 = vadd.f32 %v1208_v16, %v1207_v6 }
 0x1ac   : > { %1195 = vadd.xlane.f32.xlu1 %v1194_v15 }
 0x1ad   : > { %1210 = vadd.xlane.f32.xlu0 %v1209_v58 }
 0x1c2   : > { %s1403_s30 = spop %1402 }
 0x1c3   : > { %v1227_v63 = vstv %s1403_s30 }
 0x1c4   : > { %v1228_v37 = vsel %vm1226_vm9, %v1227_v63, 0.0 }
 0x239   : > { %v1196_v17 = vpop.xlane.xlu1 %1195 }
 0x23a   : > { %v1197_v19 = vrot.slane %v1196_v17, 4  ;;  %v1211_v57 = vpop.xlane.xlu0 %1210 }
 0x23b   : > { %v1212_v8 = vrot.slane %v1211_v57, 4 }
 0x23c   : > { %v1198_v20 = vadd.f32 %v1197_v19, %v1196_v17 }
 0x23d   : > { %v1213_v21 = vadd.f32 %v1212_v8, %v1211_v57 }
 0x23e   : > { %v1199_v18 = vrot.slane %v1198_v20, 2 }
 0x23f   : > { %v1214_v22 = vrot.slane %v1213_v21, 2 }
 0x240   : > { %v1200_v32 = vadd.f32 %v1199_v18, %v1198_v20 }
 0x241   : > { %v1215_v29 = vadd.f32 %v1214_v22, %v1213_v21 }
 0x242   : > { %v1201_v26 = vrot.slane %v1200_v32, 1 }
 0x243   : > { %v1216_v23 = vrot.slane %v1215_v29, 1 }
 0x244   : > { %v1202_v9 = vadd.f32 %v1201_v26, %v1200_v32 }
 0x245   : > { %v1217_v34 = vadd.f32 %v1216_v23, %v1215_v29 }
 0x246   : > { %1404 = vpush %v1202_v9 }
 0x247   : > { %1406 = vpush %v1217_v34 }
 0x277   : > { %s1405_s6 = spop %1404 }
 0x278   : > { %s1225_s9 = smul.f32 0.03125, %s1405_s6  ;;  %s1407_s10 = spop %1406 }
 0x279   : > { %s1223_s11 = smul.f32 0.03125, %s1407_s10 }
 0x27a   : > { %v1229_v39 = vstv %s1225_s9 }
 0x27b   : > { %v1230_v40 = vsel %vm1224_vm10, %v1229_v39, %v1228_v37  ;;  %v1231_v7 = vstv %s1223_s11 }
 0x27c   : > { %v1232_v33 = vsel %vm1222_vm11, %v1231_v7, %v1230_v40 }
 0x27d   : > { %1233 = vst [vmem:[%s246_s7] sm:$0xff] %v1232_v33 }
 0x27e   : > { %1565 = shalt.err (!%p1562_p5)
}
 0x27f   : > { %s1566_s26 = scalar_lea.hbm %s1955_s14, 128  ;;  %s1570_s6 = scalar_lea.hbm %s2006_s4, 384 }
 0x280   : > { %p1567_p6 = scmp.ne.s32.totalorder %s1955_s14, %s1566_s26  ;;  %p1571_p10 = scmp.lt.u32.totalorder %s1955_s14, %s2006_s4 }
 0x281   : > { %p1572_p11 = scmp.lt.u32.totalorder %s1570_s6, %s1566_s26  ;;  %p1574_p13 = scmp.lt.u32.totalorder %s1566_s26, %s1955_s14 }
 0x282   : > { %p1568_p7 = pnand %p1567_p6, %p1730_p4 }
 0x283   : > { %p1573_p12 = por %p1572_p11, %p1571_p10 }
 0x284   : > { %p1569_p9 = pneg %p1568_p7 }
 0x285   : > { %p1575_p0 = por %p1574_p13, %p1573_p12 }
 0x287   : > { %p1576_p1 = pnand %p1575_p0, %p1569_p9 }
 0x289   : > { %1579 = shalt.err (!%p1576_p1)
}
 0x28a   : > { %1408 = dma.vmem_to_hbm [thread:$0]  (%p1730_p4), %s1957_s8, 128, %s1955_s14, %s1235_s18  }
 0x28b PF: > { %p1414_p2 = scmp.ge.s32.totalorder %s1630_s20, 2  ;;  %s1261_s10 = sand.u32 1, %s1610_s15  }
 0x28c   : > { %s1262_s11 = scalar_lea.sflag [#allocation3], %s1261_s10 }
 0x28d   : > { %p1411_p3 = pnand %p1414_p2, %p1737_p8 }
 0x28f   : > { %1605 = dma.done.wait (!%p1411_p3), %s1262_s11, 128  }
 0x290   : > { %1607 = vsyncadd (!%p1411_p3), %s1262_s11, 4294967168  ;;  %s17_s20 = sadd.s32 1, %s1630_s20   ;;  %s2009_s15 = smov %s1614_s16 }
 0x291   : > { %p14_p5 = scmp.ge.s32.totalorder %s17_s20, 5   ;;  %s2010_s16 = smov %s1618_s17 }
 0x292   : > { %s2011_s17 = smov %s1743_s28  ;;  %s2012_s18 = smov %s1626_s19 }
 0x293   : > { %s2013_s19 = smov %s2015_s23  ;;  %16 = sbr.rel (!%p14_p5) target bundleno = 4 (0x4), region = 77 }
 0x29a   :  { %1267 = vsyncpa [#allocation3], 1 }
 0x29b   :  { %1269 = vsyncpa [#allocation3 + $0x1], 1 }

</bundles_post_ra>
